<compile_context>
chip_gen: v5e
topology: v5e:2x2
jax: 0.10.0
libtpu: 0.0.40
codegen_flags: <defaults>
</compile_context>

<pallas_src>
import functools

import jax
import jax.numpy as jnp
from jax.experimental import pallas as pl
from jax.experimental.pallas import tpu as pltpu

# list(reversed([2, 50, 100, 500, 1000])) -> [1000, 500, 100, 50, 2]
HIDDEN_DIMS = [1000, 500, 100, 50, 2]
LANE = 128
MIN_TILE_B = 16          # bf16 sublane packing = 16 rows


def _round_up(n, m):
    return ((n + m - 1) // m) * m


def _cdiv(a, b):
    return (a + b - 1) // b


def _silu(x):
    # x * sigmoid(x) with sigmoid(x) = 0.5 * (1 + tanh(x / 2)):
    # a single EUP op on the serial path between matmuls.
    return x * (0.5 * (jnp.tanh(0.5 * x) + 1.0))


def decoder_mlp_kernel(x_ref,
                       w1, b1, w2, b2, w3, b3, w4, b4, w5, b5,
                       out_ref):
    """Whole 5-layer MLP in one kernel: lane-dense MXU matmuls + SiLU."""

    def layer(h, w_ref, b_ref, act):
        acc = jnp.dot(h, w_ref[...], preferred_element_type=jnp.float32)
        acc = acc + b_ref[...]
        return _silu(acc) if act else acc

    # f32 -> bf16 cast done in-kernel (VPU) so the wrapper never materializes
    # a padded/cast copy of x in HBM.
    h = x_ref[...].astype(jnp.bfloat16)                       # (TILE_B, 1000)
    h = layer(h, w1, b1, True).astype(jnp.bfloat16)            # (TILE_B, 512)
    h = layer(h, w2, b2, True).astype(jnp.bfloat16)            # (TILE_B, 128)
    h = layer(h, w3, b3, True).astype(jnp.bfloat16)            # (TILE_B, 128)
    h = layer(h, w4, b4, True).astype(jnp.bfloat16)            # (TILE_B, 128)
    out_ref[...] = layer(h, w5, b5, False).astype(out_ref.dtype)


def prepack_params(params, unrolled_dim):
    """One-time packing: zero-pad to lane multiples, cast weights to bf16.

    Layer-1 input dim stays at 1000 (matches raw x); all downstream dims are
    padded to multiples of 128.  Zero weight rows/cols + zero bias padding
    keep padded lanes exactly 0 through SiLU (SiLU(0) = 0), so results are
    unchanged up to rounding.
    """
    dims = HIDDEN_DIMS + [unrolled_dim]
    in_dims = [dims[0]] + [_round_up(d, LANE) for d in dims[1:-1]]
    out_dims = [_round_up(d, LANE) for d in dims[1:]]
    flat = []
    for (w, b), d_i, d_o in zip(params, in_dims, out_dims):
        wp = jnp.zeros((d_i, d_o), jnp.bfloat16)
        wp = wp.at[:w.shape[0], :w.shape[1]].set(w.astype(jnp.bfloat16))
        bp = jnp.zeros((1, d_o), jnp.float32)
        bp = bp.at[:, :b.shape[1]].set(b.astype(jnp.float32))
        flat.extend([wp, bp])
    return tuple(flat)


def _choose_tile_b(batch, max_tile_b):
    """Batch tile: bound last-tile waste, >= 2 grid steps for v7x megacore."""
    if batch < 2 * MIN_TILE_B:
        # Single full-batch block (block dim == full array dim, always legal).
        return batch
    n_tiles = max(_cdiv(batch, max_tile_b), 2)
    tile = _round_up(_cdiv(batch, n_tiles), MIN_TILE_B)
    return min(tile, max_tile_b)


@functools.partial(jax.jit, static_argnums=(2, 3))
def decoder_forward(x, packed_params, unrolled_dim, max_tile_b=1024):
    """x: (B, 1000) float32, packed_params from prepack_params.

    Returns (B, unrolled_dim // 3, 3) float32.
    """
    B, d_in = x.shape
    out_pad = packed_params[-2].shape[1]     # padded output feature dim

    tile_b = _choose_tile_b(B, max_tile_b)
    grid = (_cdiv(B, tile_b),)               # partial last block is fine:
                                             # rows are independent, OOB writes dropped.

    in_specs = [pl.BlockSpec((tile_b, d_in), lambda i: (i, 0))]
    for p in packed_params:
        # Full-array blocks with constant index maps -> params stay resident
        # in VMEM across all batch tiles (no per-step re-DMA).
        in_specs.append(pl.BlockSpec(p.shape, lambda i: (0, 0)))

    out_flat = pl.pallas_call(
        decoder_mlp_kernel,
        out_shape=jax.ShapeDtypeStruct((B, out_pad), jnp.float32),
        grid=grid,
        in_specs=in_specs,
        out_specs=pl.BlockSpec((tile_b, out_pad), lambda i: (i, 0)),
        compiler_params=pltpu.CompilerParams(
            dimension_semantics=("parallel",),
            vmem_limit_bytes=64 * 1024 * 1024),
    )(x, *packed_params)

    # Strip lane padding, then the module's view(B, U // 3, 3).
    return out_flat[:, :unrolled_dim].reshape(B, unrolled_dim // 3, 3)


def init_params(key, unrolled_dim):
    """PyTorch-style uniform(-1/sqrt(fan_in), 1/sqrt(fan_in)) init.

    Weights stored as (in_features, out_features) = transpose of nn.Linear.
    """
    dims = HIDDEN_DIMS + [unrolled_dim]
    params = []
    for i in range(len(dims) - 1):
        fan_in, fan_out = dims[i], dims[i + 1]
        key, kw, kb = jax.random.split(key, 3)
        bound = 1.0 / float(fan_in) ** 0.5
        w = jax.random.uniform(kw, (fan_in, fan_out), jnp.float32, -bound, bound)
        b = jax.random.uniform(kb, (1, fan_out), jnp.float32, -bound, bound)
        params.append((w, b))
    return params


def decoder_reference(x, params, unrolled_dim):
    """Plain-JAX f32 reference for correctness checking."""
    h = x
    for i, (w, b) in enumerate(params):
        h = h @ w + b
        if i < len(params) - 1:
            h = h * jax.nn.sigmoid(h)
    return h.reshape(x.shape[0], unrolled_dim // 3, 3)


if __name__ == "__main__":
    key = jax.random.PRNGKey(0)
    key, k_x = jax.random.split(key)

    batch = 2
    unrolled_dim = 12                      # must be divisible by 3

    x = jax.random.normal(k_x, (batch, HIDDEN_DIMS[0]), dtype=jnp.float32)
    params = init_params(key, unrolled_dim)
    packed = prepack_params(params, unrolled_dim)   # one-time weight packing

    out = decoder_forward(x, packed, unrolled_dim)
    out = jax.block_until_ready(out)

    ref = decoder_reference(x, params, unrolled_dim)
    assert out.shape == (batch, unrolled_dim // 3, 3)
    # bf16 matmul inputs/activations -> loosened tolerance vs f32 reference.
    assert jnp.allclose(out, ref, atol=5e-2, rtol=5e-2), (
        float(jnp.max(jnp.abs(out - ref))))

    print("KERNEL_OK")
</pallas_src>

<mosaic_0001>
module attributes {stable_mosaic.version = 11 : i64} {
  func.func @decoder_mlp_kernel(%arg0: i32, %arg1: memref<2x1000xf32, #tpu.memory_space<vmem>>, %arg2: memref<1000x512xbf16, #tpu.memory_space<vmem>>, %arg3: memref<1x512xf32, #tpu.memory_space<vmem>>, %arg4: memref<512x128xbf16, #tpu.memory_space<vmem>>, %arg5: memref<1x128xf32, #tpu.memory_space<vmem>>, %arg6: memref<128x128xbf16, #tpu.memory_space<vmem>>, %arg7: memref<1x128xf32, #tpu.memory_space<vmem>>, %arg8: memref<128x128xbf16, #tpu.memory_space<vmem>>, %arg9: memref<1x128xf32, #tpu.memory_space<vmem>>, %arg10: memref<128x128xbf16, #tpu.memory_space<vmem>>, %arg11: memref<1x128xf32, #tpu.memory_space<vmem>>, %arg12: memref<2x128xf32, #tpu.memory_space<vmem>>) attributes {dimension_semantics = [#tpu.dimension_semantics<parallel>], iteration_bounds = array<i64: 1>, scalar_prefetch = 0 : i64, scratch_operands = 0 : i64, tpu.core_type = #tpu.core_type<tc>, window_params = [{transform_indices = @transform_0, window_bounds = array<i64: 2, 1000>}, {pipeline_mode = #tpu.pipeline_mode<synchronous>, transform_indices = @transform_1, window_bounds = array<i64: 1000, 512>}, {pipeline_mode = #tpu.pipeline_mode<synchronous>, transform_indices = @transform_2, window_bounds = array<i64: 1, 512>}, {pipeline_mode = #tpu.pipeline_mode<synchronous>, transform_indices = @transform_3, window_bounds = array<i64: 512, 128>}, {pipeline_mode = #tpu.pipeline_mode<synchronous>, transform_indices = @transform_4, window_bounds = array<i64: 1, 128>}, {pipeline_mode = #tpu.pipeline_mode<synchronous>, transform_indices = @transform_5, window_bounds = array<i64: 128, 128>}, {pipeline_mode = #tpu.pipeline_mode<synchronous>, transform_indices = @transform_6, window_bounds = array<i64: 1, 128>}, {pipeline_mode = #tpu.pipeline_mode<synchronous>, transform_indices = @transform_7, window_bounds = array<i64: 128, 128>}, {pipeline_mode = #tpu.pipeline_mode<synchronous>, transform_indices = @transform_8, window_bounds = array<i64: 1, 128>}, {pipeline_mode = #tpu.pipeline_mode<synchronous>, transform_indices = @transform_9, window_bounds = array<i64: 128, 128>}, {pipeline_mode = #tpu.pipeline_mode<synchronous>, transform_indices = @transform_10, window_bounds = array<i64: 1, 128>}, {transform_indices = @transform_11, window_bounds = array<i64: 2, 128>}]} {
    %c0 = arith.constant 0 : index
    %c0_0 = arith.constant 0 : index
    %0 = vector.load %arg1[%c0, %c0_0] : memref<2x1000xf32, #tpu.memory_space<vmem>>, vector<2x1000xf32>
    %1 = arith.truncf %0 : vector<2x1000xf32> to vector<2x1000xbf16>
    %c0_1 = arith.constant 0 : index
    %c0_2 = arith.constant 0 : index
    %2 = vector.load %arg2[%c0_1, %c0_2] : memref<1000x512xbf16, #tpu.memory_space<vmem>>, vector<1000x512xbf16>
    %cst = arith.constant dense<0.000000e+00> : vector<2x512xf32>
    %3 = tpu.matmul %1, %2, %cst {dimension_numbers = #tpu.dot_dimension_numbers<[1], [0], [0], [1], [0, 0, 1, 1], [], []>} : vector<2x1000xbf16>, vector<1000x512xbf16>, vector<2x512xf32> -> vector<2x512xf32>
    %c0_3 = arith.constant 0 : index
    %c0_4 = arith.constant 0 : index
    %4 = vector.load %arg3[%c0_3, %c0_4] : memref<1x512xf32, #tpu.memory_space<vmem>>, vector<1x512xf32>
    %5 = vector.broadcast %4 : vector<1x512xf32> to vector<2x512xf32>
    %6 = arith.addf %3, %5 : vector<2x512xf32>
    %cst_5 = arith.constant 5.000000e-01 : f32
    %7 = vector.broadcast %cst_5 : f32 to vector<2x512xf32>
    %8 = arith.mulf %7, %6 : vector<2x512xf32>
    %9 = math.tanh %8 : vector<2x512xf32>
    %cst_6 = arith.constant 1.000000e+00 : f32
    %10 = vector.broadcast %cst_6 : f32 to vector<2x512xf32>
    %11 = arith.addf %9, %10 : vector<2x512xf32>
    %cst_7 = arith.constant 5.000000e-01 : f32
    %12 = vector.broadcast %cst_7 : f32 to vector<2x512xf32>
    %13 = arith.mulf %12, %11 : vector<2x512xf32>
    %14 = arith.mulf %6, %13 : vector<2x512xf32>
    %15 = arith.truncf %14 : vector<2x512xf32> to vector<2x512xbf16>
    %c0_8 = arith.constant 0 : index
    %c0_9 = arith.constant 0 : index
    %16 = vector.load %arg4[%c0_8, %c0_9] : memref<512x128xbf16, #tpu.memory_space<vmem>>, vector<512x128xbf16>
    %cst_10 = arith.constant dense<0.000000e+00> : vector<2x128xf32>
    %17 = tpu.matmul %15, %16, %cst_10 {dimension_numbers = #tpu.dot_dimension_numbers<[1], [0], [0], [1], [0, 0, 1, 1], [], []>} : vector<2x512xbf16>, vector<512x128xbf16>, vector<2x128xf32> -> vector<2x128xf32>
    %c0_11 = arith.constant 0 : index
    %c0_12 = arith.constant 0 : index
    %18 = vector.load %arg5[%c0_11, %c0_12] : memref<1x128xf32, #tpu.memory_space<vmem>>, vector<1x128xf32>
    %19 = vector.broadcast %18 : vector<1x128xf32> to vector<2x128xf32>
    %20 = arith.addf %17, %19 : vector<2x128xf32>
    %cst_13 = arith.constant 5.000000e-01 : f32
    %21 = vector.broadcast %cst_13 : f32 to vector<2x128xf32>
    %22 = arith.mulf %21, %20 : vector<2x128xf32>
    %23 = math.tanh %22 : vector<2x128xf32>
    %cst_14 = arith.constant 1.000000e+00 : f32
    %24 = vector.broadcast %cst_14 : f32 to vector<2x128xf32>
    %25 = arith.addf %23, %24 : vector<2x128xf32>
    %cst_15 = arith.constant 5.000000e-01 : f32
    %26 = vector.broadcast %cst_15 : f32 to vector<2x128xf32>
    %27 = arith.mulf %26, %25 : vector<2x128xf32>
    %28 = arith.mulf %20, %27 : vector<2x128xf32>
    %29 = arith.truncf %28 : vector<2x128xf32> to vector<2x128xbf16>
    %c0_16 = arith.constant 0 : index
    %c0_17 = arith.constant 0 : index
    %30 = vector.load %arg6[%c0_16, %c0_17] : memref<128x128xbf16, #tpu.memory_space<vmem>>, vector<128x128xbf16>
    %cst_18 = arith.constant dense<0.000000e+00> : vector<2x128xf32>
    %31 = tpu.matmul %29, %30, %cst_18 {dimension_numbers = #tpu.dot_dimension_numbers<[1], [0], [0], [1], [0, 0, 1, 1], [], []>} : vector<2x128xbf16>, vector<128x128xbf16>, vector<2x128xf32> -> vector<2x128xf32>
    %c0_19 = arith.constant 0 : index
    %c0_20 = arith.constant 0 : index
    %32 = vector.load %arg7[%c0_19, %c0_20] : memref<1x128xf32, #tpu.memory_space<vmem>>, vector<1x128xf32>
    %33 = vector.broadcast %32 : vector<1x128xf32> to vector<2x128xf32>
    %34 = arith.addf %31, %33 : vector<2x128xf32>
    %cst_21 = arith.constant 5.000000e-01 : f32
    %35 = vector.broadcast %cst_21 : f32 to vector<2x128xf32>
    %36 = arith.mulf %35, %34 : vector<2x128xf32>
    %37 = math.tanh %36 : vector<2x128xf32>
    %cst_22 = arith.constant 1.000000e+00 : f32
    %38 = vector.broadcast %cst_22 : f32 to vector<2x128xf32>
    %39 = arith.addf %37, %38 : vector<2x128xf32>
    %cst_23 = arith.constant 5.000000e-01 : f32
    %40 = vector.broadcast %cst_23 : f32 to vector<2x128xf32>
    %41 = arith.mulf %40, %39 : vector<2x128xf32>
    %42 = arith.mulf %34, %41 : vector<2x128xf32>
    %43 = arith.truncf %42 : vector<2x128xf32> to vector<2x128xbf16>
    %c0_24 = arith.constant 0 : index
    %c0_25 = arith.constant 0 : index
    %44 = vector.load %arg8[%c0_24, %c0_25] : memref<128x128xbf16, #tpu.memory_space<vmem>>, vector<128x128xbf16>
    %cst_26 = arith.constant dense<0.000000e+00> : vector<2x128xf32>
    %45 = tpu.matmul %43, %44, %cst_26 {dimension_numbers = #tpu.dot_dimension_numbers<[1], [0], [0], [1], [0, 0, 1, 1], [], []>} : vector<2x128xbf16>, vector<128x128xbf16>, vector<2x128xf32> -> vector<2x128xf32>
    %c0_27 = arith.constant 0 : index
    %c0_28 = arith.constant 0 : index
    %46 = vector.load %arg9[%c0_27, %c0_28] : memref<1x128xf32, #tpu.memory_space<vmem>>, vector<1x128xf32>
    %47 = vector.broadcast %46 : vector<1x128xf32> to vector<2x128xf32>
    %48 = arith.addf %45, %47 : vector<2x128xf32>
    %cst_29 = arith.constant 5.000000e-01 : f32
    %49 = vector.broadcast %cst_29 : f32 to vector<2x128xf32>
    %50 = arith.mulf %49, %48 : vector<2x128xf32>
    %51 = math.tanh %50 : vector<2x128xf32>
    %cst_30 = arith.constant 1.000000e+00 : f32
    %52 = vector.broadcast %cst_30 : f32 to vector<2x128xf32>
    %53 = arith.addf %51, %52 : vector<2x128xf32>
    %cst_31 = arith.constant 5.000000e-01 : f32
    %54 = vector.broadcast %cst_31 : f32 to vector<2x128xf32>
    %55 = arith.mulf %54, %53 : vector<2x128xf32>
    %56 = arith.mulf %48, %55 : vector<2x128xf32>
    %57 = arith.truncf %56 : vector<2x128xf32> to vector<2x128xbf16>
    %c0_32 = arith.constant 0 : index
    %c0_33 = arith.constant 0 : index
    %58 = vector.load %arg10[%c0_32, %c0_33] : memref<128x128xbf16, #tpu.memory_space<vmem>>, vector<128x128xbf16>
    %cst_34 = arith.constant dense<0.000000e+00> : vector<2x128xf32>
    %59 = tpu.matmul %57, %58, %cst_34 {dimension_numbers = #tpu.dot_dimension_numbers<[1], [0], [0], [1], [0, 0, 1, 1], [], []>} : vector<2x128xbf16>, vector<128x128xbf16>, vector<2x128xf32> -> vector<2x128xf32>
    %c0_35 = arith.constant 0 : index
    %c0_36 = arith.constant 0 : index
    %60 = vector.load %arg11[%c0_35, %c0_36] : memref<1x128xf32, #tpu.memory_space<vmem>>, vector<1x128xf32>
    %61 = vector.broadcast %60 : vector<1x128xf32> to vector<2x128xf32>
    %62 = arith.addf %59, %61 : vector<2x128xf32>
    %c0_37 = arith.constant 0 : index
    %c0_38 = arith.constant 0 : index
    %63 = vector.load %arg12[%c0_37, %c0_38] : memref<2x128xf32, #tpu.memory_space<vmem>>, vector<2x128xf32>
    tpu.vector_store %arg12[%c0_37, %c0_38], %62 {strides = array<i32>} : memref<2x128xf32, #tpu.memory_space<vmem>>, vector<2x128xf32>,
    return
  }
  func.func @transform_0(%arg0: i32) -> (i32, i32) {
    %c0_i32 = arith.constant 0 : i32
    %c0_i32_0 = arith.constant 0 : i32
    return %arg0, %c0_i32 : i32, i32
  }
  func.func @transform_1(%arg0: i32) -> (i32, i32) {
    %c0_i32 = arith.constant 0 : i32
    %c0_i32_0 = arith.constant 0 : i32
    %c0_i32_1 = arith.constant 0 : i32
    return %c0_i32, %c0_i32_0 : i32, i32
  }
  func.func @transform_2(%arg0: i32) -> (i32, i32) {
    %c0_i32 = arith.constant 0 : i32
    %c0_i32_0 = arith.constant 0 : i32
    %c0_i32_1 = arith.constant 0 : i32
    return %c0_i32, %c0_i32_0 : i32, i32
  }
  func.func @transform_3(%arg0: i32) -> (i32, i32) {
    %c0_i32 = arith.constant 0 : i32
    %c0_i32_0 = arith.constant 0 : i32
    %c0_i32_1 = arith.constant 0 : i32
    return %c0_i32, %c0_i32_0 : i32, i32
  }
  func.func @transform_4(%arg0: i32) -> (i32, i32) {
    %c0_i32 = arith.constant 0 : i32
    %c0_i32_0 = arith.constant 0 : i32
    %c0_i32_1 = arith.constant 0 : i32
    return %c0_i32, %c0_i32_0 : i32, i32
  }
  func.func @transform_5(%arg0: i32) -> (i32, i32) {
    %c0_i32 = arith.constant 0 : i32
    %c0_i32_0 = arith.constant 0 : i32
    %c0_i32_1 = arith.constant 0 : i32
    return %c0_i32, %c0_i32_0 : i32, i32
  }
  func.func @transform_6(%arg0: i32) -> (i32, i32) {
    %c0_i32 = arith.constant 0 : i32
    %c0_i32_0 = arith.constant 0 : i32
    %c0_i32_1 = arith.constant 0 : i32
    return %c0_i32, %c0_i32_0 : i32, i32
  }
  func.func @transform_7(%arg0: i32) -> (i32, i32) {
    %c0_i32 = arith.constant 0 : i32
    %c0_i32_0 = arith.constant 0 : i32
    %c0_i32_1 = arith.constant 0 : i32
    return %c0_i32, %c0_i32_0 : i32, i32
  }
  func.func @transform_8(%arg0: i32) -> (i32, i32) {
    %c0_i32 = arith.constant 0 : i32
    %c0_i32_0 = arith.constant 0 : i32
    %c0_i32_1 = arith.constant 0 : i32
    return %c0_i32, %c0_i32_0 : i32, i32
  }
  func.func @transform_9(%arg0: i32) -> (i32, i32) {
    %c0_i32 = arith.constant 0 : i32
    %c0_i32_0 = arith.constant 0 : i32
    %c0_i32_1 = arith.constant 0 : i32
    return %c0_i32, %c0_i32_0 : i32, i32
  }
  func.func @transform_10(%arg0: i32) -> (i32, i32) {
    %c0_i32 = arith.constant 0 : i32
    %c0_i32_0 = arith.constant 0 : i32
    %c0_i32_1 = arith.constant 0 : i32
    return %c0_i32, %c0_i32_0 : i32, i32
  }
  func.func @transform_11(%arg0: i32) -> (i32, i32) {
    %c0_i32 = arith.constant 0 : i32
    %c0_i32_0 = arith.constant 0 : i32
    return %arg0, %c0_i32 : i32, i32
  }
}

</mosaic_0001>

<bundles_post_ra>
// kernel: decoder_forward.1
= control target key start
LH: loop header
LB: loop body
LE: loop exit
PB: predicated region body
PF: predicated region fallthrough
CT: control target
= control target key end

     0   :  { %16 = vsyncpa [#allocation3], 0  ;;  %s4661_s0 = inlined_call_operand.hbm [shape: f32[2,1000], index: 0, kind: input, shape index: {}]   ;;  %s4662_s1 = inlined_call_operand.hbm [shape: bf16[1000,512], index: 1, kind: input, shape index: {}]   ;;  %s4663_s2 = inlined_call_operand.hbm [shape: f32[1,512], index: 2, kind: input, shape index: {}]   ;;  %s4664_s3 = inlined_call_operand.hbm [shape: bf16[512,128], index: 3, kind: input, shape index: {}]   ;;  %s4665_s4 = inlined_call_operand.vmem [shape: f32[1,128], index: 4, kind: input, shape index: {}]   ;;  %s4666_s5 = inlined_call_operand.hbm [shape: bf16[128,128], index: 5, kind: input, shape index: {}]   ;;  %s4667_s6 = inlined_call_operand.vmem [shape: f32[1,128], index: 6, kind: input, shape index: {}]   ;;  %s4668_s7 = inlined_call_operand.hbm [shape: bf16[128,128], index: 7, kind: input, shape index: {}]   ;;  %s4669_s8 = inlined_call_operand.vmem [shape: f32[1,128], index: 8, kind: input, shape index: {}]   ;;  %s4670_s9 = inlined_call_operand.hbm [shape: bf16[128,128], index: 9, kind: input, shape index: {}]   ;;  %s4671_s10 = inlined_call_operand.vmem [shape: f32[1,128], index: 10, kind: input, shape index: {}]   ;;  %s4672_s11 = inlined_call_operand.vmem [shape: f32[2,128], index: 11, kind: output, shape index: {}]  }
   0x1   :  { %17 = vsyncpa [#allocation5], 0 }
   0x2   :  { %18 = vsyncpa [#allocation8], 0  ;;  %s35_s19 = sshll.u32 %s4662_s1, 4  ;;  %s36_s19 = int_to_ptr.hbm [resolvable:$true] %s35_s19 }
   0x3   :  { %19 = vsyncpa [#allocation11], 0  ;;  %s4453_s20 = smov [#allocation4]   ;;  %s59_s24 = sshll.u32 %s4664_s3, 4  ;;  %s60_s24 = int_to_ptr.hbm [resolvable:$true] %s59_s24 }
   0x4   :  { %s37_s21 = sshll.u32 %s4453_s20, 4  ;;  %s4454_s25 = smov 256   ;;  %s38_s21 = int_to_ptr.vmem [resolvable:$true] %s37_s21 }
   0x5   :  { %s4455_s26 = smov 16   ;;  %s4456_s27 = smov [#allocation7]  }
   0x6   :  { %43 = dma.hbm_to_vmem [thread:$0]  %s36_s19, 32000, %s38_s21, [#allocation5], %s4454_s25, %s4454_s25, %s4455_s26  }
   0x7   :  { %s61_s28 = sshll.u32 %s4456_s27, 4  ;;  %s4457_s29 = smov 64   ;;  %s62_s28 = int_to_ptr.vmem [resolvable:$true] %s61_s28 }
   0x8   :  { %s4458_s30 = smov 4   ;;  %s89_s13 = sshll.u32 %s4668_s7, 4  ;;  %s90_s13 = int_to_ptr.hbm [resolvable:$true] %s89_s13 }
   0x9   :  { %67 = dma.hbm_to_vmem [thread:$0]  %s60_s24, 4096, %s62_s28, [#allocation8], %s4457_s29, %s4457_s29, %s4458_s30  }
   0xa   :  { %s4459_s14 = smov [#allocation10]   ;;  %s25_s17 = sshll.u32 %s4661_s0, 4  ;;  %s26_s17 = int_to_ptr.hbm [resolvable:$true] %s25_s17 }
   0xb   :  { %s91_s3 = sshll.u32 %s4459_s14, 4  ;;  %s4460_s18 = smov [#allocation2]   ;;  %s92_s3 = int_to_ptr.vmem [resolvable:$true] %s91_s3 }
   0xc   :  { %97 = dma.hbm_to_vmem [thread:$0]  %s90_s13, 1024, %s92_s3, [#allocation11], %s4457_s29, %s4457_s29, %s4458_s30  }
   0xd   :  { %s27_s19 = sshll.u32 %s4460_s18, 4  ;;  %s49_s22 = sshll.u32 %s4663_s2, 4  ;;  %s28_s19 = int_to_ptr.vmem [resolvable:$true] %s27_s19  ;;  %s50_s22 = int_to_ptr.hbm [resolvable:$true] %s49_s22 }
   0xe   :  { %30 = dma.hbm_to_vmem [thread:$0]  %s26_s17, 256, %s28_s19, [#allocation3]  }
   0xf   :  { %s74_s24 = sshll.u32 %s4666_s5, 4  ;;  %s4461_s25 = smov [#allocation6]   ;;  %s75_s24 = int_to_ptr.hbm [resolvable:$true] %s74_s24 }
  0x10   :  { %s51_s0 = sshll.u32 %s4461_s25, 4  ;;  %s4462_s26 = smov [#allocation9]   ;;  %s52_s0 = int_to_ptr.vmem [resolvable:$true] %s51_s0 }
  0x11   :  { %54 = dma.hbm_to_vmem [thread:$0]  %s50_s22, 64, %s52_s0, [#allocation5]  }
  0x12   :  { %s76_s27 = sshll.u32 %s4462_s26, 4  ;;  %s104_s12 = sshll.u32 %s4670_s9, 4  ;;  %s77_s27 = int_to_ptr.vmem [resolvable:$true] %s76_s27  ;;  %s105_s12 = int_to_ptr.hbm [resolvable:$true] %s104_s12 }
  0x13   :  { %82 = dma.hbm_to_vmem [thread:$0]  %s75_s24, 1024, %s77_s27, [#allocation8], %s4457_s29, %s4457_s29, %s4458_s30  }
  0x14   :  { %s4463_s2 = smov [#allocation12]  }
  0x15   :  { %s106_s13 = sshll.u32 %s4463_s2, 4  ;;  %s107_s13 = int_to_ptr.vmem [resolvable:$true] %s106_s13 }
  0x16   :  { %112 = dma.hbm_to_vmem [thread:$0]  %s105_s12, 1024, %s107_s13, [#allocation11], %s4457_s29, %s4457_s29, %s4458_s30  }
  0x17   :  { %4445 = dma.done.wait [#allocation3], 256  }
  0x18   :  { %4446 = vsyncadd [#allocation3], 4294967040 }
  0x19   :  { %4447 = dma.done.wait [#allocation5], 32064  }
  0x1a   :  { %4448 = vsyncadd [#allocation5], 4294935232 }
  0x1b   :  { %4449 = dma.done.wait [#allocation8], 5120  }
  0x1c   :  { %4450 = vsyncadd [#allocation8], 4294962176 }
  0x1d   :  { %4451 = dma.done.wait [#allocation11], 2048  }
  0x1e   :  { %4452 = vsyncadd [#allocation11], 4294965248  ;;  %v2838_v0 = vld [vmem:[#allocation4 + $0xe0] sm:$0xf]  ;;  %v3974_v1 = vld [vmem:[#allocation4 + $0xec] sm:$0xf0] }
  0x1f   :  { %v3094_v2 = vld [vmem:[#allocation4 + $0x2e0] sm:$0xf]  ;;  %v2839_v3 = vor.u32 %v3974_v1, %v2838_v0  ;;  %v4038_v4 = vld [vmem:[#allocation4 + $0x2ec] sm:$0xf0]  ;;  %vm1689_vm0 = vcmask 1043456   ;;  %vm1685_vm1 = vcmask 850944  }
  0x20   :  { %v3222_v5 = vld [vmem:[#allocation4 + $0x3e0] sm:$0xf]  ;;  %v4070_v6 = vld [vmem:[#allocation4 + $0x3ec] sm:$0xf0]  ;;  %v3095_v7 = vor.u32 %v4038_v4, %v3094_v2 }
  0x21   :  { %v3223_v8 = vor.u32 %v4070_v6, %v3222_v5  ;;  %v2966_v9 = vld [vmem:[#allocation4 + $0x1e0] sm:$0xf]  ;;  %v4006_v10 = vld [vmem:[#allocation4 + $0x1ec] sm:$0xf0]  ;;  %1702 = vmatpush.bf16.msra.mxu0 %v2839_v3 }
  0x22   :  { %v2822_v11 = vld [vmem:[#allocation4 + $0xc0] sm:$0xf]  ;;  %v2967_v12 = vor.u32 %v4006_v10, %v2966_v9  ;;  %v3970_v13 = vld [vmem:[#allocation4 + $0xcc] sm:$0xf0]  ;;  %1728 = vmatpush.bf16.msra.mxu2 %v3095_v7 }
  0x23   :  { %v3078_v14 = vld [vmem:[#allocation4 + $0x2c0] sm:$0xf]  ;;  %v4034_v15 = vld [vmem:[#allocation4 + $0x2cc] sm:$0xf0]  ;;  %1741 = vmatpush.bf16.msra.mxu3 %v3223_v8  ;;  %v2823_v16 = vor.u32 %v3970_v13, %v2822_v11 }
  0x24   :  { %v3079_v17 = vor.u32 %v4034_v15, %v3078_v14  ;;  %v3206_v18 = vld [vmem:[#allocation4 + $0x3c0] sm:$0xf]  ;;  %v4066_v19 = vld [vmem:[#allocation4 + $0x3cc] sm:$0xf0]  ;;  %1715 = vmatpush.bf16.msra.mxu1 %v2967_v12 }
  0x25   :  { %v2950_v20 = vld [vmem:[#allocation4 + $0x1c0] sm:$0xf]  ;;  %v3207_v21 = vor.u32 %v4066_v19, %v3206_v18  ;;  %v4002_v22 = vld [vmem:[#allocation4 + $0x1cc] sm:$0xf0]  ;;  %1703 = vmatpush.bf16.msra.mxu0 %v2823_v16 }
  0x26   :  { %v2806_v23 = vld [vmem:[#allocation4 + $0xa0] sm:$0xf]  ;;  %v3966_v24 = vld [vmem:[#allocation4 + $0xac] sm:$0xf0]  ;;  %v2951_v25 = vor.u32 %v4002_v22, %v2950_v20  ;;  %1729 = vmatpush.bf16.msra.mxu2 %v3079_v17 }
  0x27   :  { %v3062_v26 = vld [vmem:[#allocation4 + $0x2a0] sm:$0xf]  ;;  %v4030_v27 = vld [vmem:[#allocation4 + $0x2ac] sm:$0xf0]  ;;  %v2807_v29 = vor.u32 %v3966_v24, %v2806_v23  ;;  %1742 = vmatpush.bf16.msra.mxu3 %v3207_v21 }
  0x28   :  { %v3190_v28 = vld [vmem:[#allocation4 + $0x3a0] sm:$0xf]  ;;  %v4062_v30 = vld [vmem:[#allocation4 + $0x3ac] sm:$0xf0]  ;;  %v3063_v33 = vor.u32 %v4030_v27, %v3062_v26  ;;  %1716 = vmatpush.bf16.msra.mxu1 %v2951_v25 }
  0x29   :  { %v2934_v31 = vld [vmem:[#allocation4 + $0x1a0] sm:$0xf]  ;;  %v3998_v32 = vld [vmem:[#allocation4 + $0x1ac] sm:$0xf0]  ;;  %v3191_v34 = vor.u32 %v4062_v30, %v3190_v28  ;;  %1704 = vmatpush.bf16.msra.mxu0 %v2807_v29 }
  0x2a   :  { %v2790_v35 = vld [vmem:[#allocation4 + $0x80] sm:$0xf]  ;;  %v3962_v36 = vld [vmem:[#allocation4 + $0x8c] sm:$0xf0]  ;;  %v2935_v38 = vor.u32 %v3998_v32, %v2934_v31  ;;  %1730 = vmatpush.bf16.msra.mxu2 %v3063_v33 }
  0x2b   :  { %v3046_v37 = vld [vmem:[#allocation4 + $0x280] sm:$0xf]  ;;  %v4026_v39 = vld [vmem:[#allocation4 + $0x28c] sm:$0xf0]  ;;  %v2791_v44 = vor.u32 %v3962_v36, %v2790_v35  ;;  %1743 = vmatpush.bf16.msra.mxu3 %v3191_v34 }
  0x2c   :  { %v3174_v40 = vld [vmem:[#allocation4 + $0x380] sm:$0xf]  ;;  %v4058_v41 = vld [vmem:[#allocation4 + $0x38c] sm:$0xf0]  ;;  %v3047_v45 = vor.u32 %v4026_v39, %v3046_v37  ;;  %1717 = vmatpush.bf16.msra.mxu1 %v2935_v38 }
  0x2d   :  { %v2918_v42 = vld [vmem:[#allocation4 + $0x180] sm:$0xf]  ;;  %v3994_v43 = vld [vmem:[#allocation4 + $0x18c] sm:$0xf0]  ;;  %v3175_v46 = vor.u32 %v4058_v41, %v3174_v40  ;;  %1705 = vmatpush.bf16.msra.mxu0 %v2791_v44 }
  0x2e   :  { %v2774_v47 = vld [vmem:[#allocation4 + $0x60] sm:$0xf]  ;;  %v3958_v48 = vld [vmem:[#allocation4 + $0x6c] sm:$0xf0]  ;;  %v2919_v50 = vor.u32 %v3994_v43, %v2918_v42  ;;  %1731 = vmatpush.bf16.msra.mxu2 %v3047_v45 }
  0x2f   :  { %v3030_v49 = vld [vmem:[#allocation4 + $0x260] sm:$0xf]  ;;  %v4022_v51 = vld [vmem:[#allocation4 + $0x26c] sm:$0xf0]  ;;  %v2775_v56 = vor.u32 %v3958_v48, %v2774_v47  ;;  %1744 = vmatpush.bf16.msra.mxu3 %v3175_v46 }
  0x30   :  { %v3158_v52 = vld [vmem:[#allocation4 + $0x360] sm:$0xf]  ;;  %v4054_v53 = vld [vmem:[#allocation4 + $0x36c] sm:$0xf0]  ;;  %v3031_v57 = vor.u32 %v4022_v51, %v3030_v49  ;;  %1718 = vmatpush.bf16.msra.mxu1 %v2919_v50 }
  0x31   :  { %v2902_v54 = vld [vmem:[#allocation4 + $0x160] sm:$0xf]  ;;  %v3990_v55 = vld [vmem:[#allocation4 + $0x16c] sm:$0xf0]  ;;  %v3159_v58 = vor.u32 %v4054_v53, %v3158_v52  ;;  %1706 = vmatpush.bf16.msra.mxu0 %v2775_v56 }
  0x32   :  { %v2758_v59 = vld [vmem:[#allocation4 + $0x40] sm:$0xf]  ;;  %v3954_v60 = vld [vmem:[#allocation4 + $0x4c] sm:$0xf0]  ;;  %v2903_v62 = vor.u32 %v3990_v55, %v2902_v54  ;;  %1732 = vmatpush.bf16.msra.mxu2 %v3031_v57 }
  0x33   :  { %v3014_v61 = vld [vmem:[#allocation4 + $0x240] sm:$0xf]  ;;  %v4018_v63 = vld [vmem:[#allocation4 + $0x24c] sm:$0xf0]  ;;  %v2759_v4 = vor.u32 %v3954_v60, %v2758_v59  ;;  %1745 = vmatpush.bf16.msra.mxu3 %v3159_v58 }
  0x34   :  { %v3142_v0 = vld [vmem:[#allocation4 + $0x340] sm:$0xf]  ;;  %v4050_v1 = vld [vmem:[#allocation4 + $0x34c] sm:$0xf0]  ;;  %v3015_v5 = vor.u32 %v4018_v63, %v3014_v61  ;;  %1719 = vmatpush.bf16.msra.mxu1 %v2903_v62 }
  0x35   :  { %v2886_v2 = vld [vmem:[#allocation4 + $0x140] sm:$0xf]  ;;  %v3986_v3 = vld [vmem:[#allocation4 + $0x14c] sm:$0xf0]  ;;  %v3143_v6 = vor.u32 %v4050_v1, %v3142_v0  ;;  %1707 = vmatpush.bf16.msra.mxu0 %v2759_v4 }
  0x36   :  { %v2742_v7 = vld [vmem:[#allocation4 + $0x20] sm:$0xf]  ;;  %v3950_v8 = vld [vmem:[#allocation4 + $0x2c] sm:$0xf0]  ;;  %v2887_v10 = vor.u32 %v3986_v3, %v2886_v2  ;;  %1733 = vmatpush.bf16.msra.mxu2 %v3015_v5 }
  0x37   :  { %v2998_v9 = vld [vmem:[#allocation4 + $0x220] sm:$0xf]  ;;  %v4014_v11 = vld [vmem:[#allocation4 + $0x22c] sm:$0xf0]  ;;  %v2743_v17 = vor.u32 %v3950_v8, %v2742_v7  ;;  %1746 = vmatpush.bf16.msra.mxu3 %v3143_v6 }
  0x38   :  { %v3126_v12 = vld [vmem:[#allocation4 + $0x320] sm:$0xf]  ;;  %v4046_v13 = vld [vmem:[#allocation4 + $0x32c] sm:$0xf0]  ;;  %v2999_v20 = vor.u32 %v4014_v11, %v2998_v9  ;;  %1720 = vmatpush.bf16.msra.mxu1 %v2887_v10 }
  0x39   :  { %v2870_v14 = vld [vmem:[#allocation4 + $0x120] sm:$0xf]  ;;  %v3982_v15 = vld [vmem:[#allocation4 + $0x12c] sm:$0xf0]  ;;  %v3127_v21 = vor.u32 %v4046_v13, %v3126_v12  ;;  %1708 = vmatpush.bf16.msra.mxu0 %v2743_v17 }
  0x3a   :  { %v4557_v16 = vld [vmem:[#allocation4 + $0x7c0] sm:$0xff]  ;;  %v3946_v22 = vld [vmem:[#allocation4 + $0xc] sm:$0xf0]  ;;  %v2871_v25 = vor.u32 %v3982_v15, %v2870_v14  ;;  %1734 = vmatpush.bf16.msra.mxu2 %v2999_v20 }
  0x3b   :  { %v2726_v18 = vld [vmem:[#allocation4] sm:$0xf]  ;;  %v1181_v19 = vunpack.c.l.b16 %v4557_v16  ;;  %v4010_v24 = vld [vmem:[#allocation4 + $0x20c] sm:$0xf0]  ;;  %1747 = vmatpush.bf16.msra.mxu3 %v3127_v21 }
  0x3c   :  { %v2982_v23 = vld [vmem:[#allocation4 + $0x200] sm:$0xf]  ;;  %v4042_v27 = vld [vmem:[#allocation4 + $0x30c] sm:$0xf0]  ;;  %v2727_v32 = vor.u32 %v3946_v22, %v2726_v18  ;;  %1721 = vmatpush.bf16.msra.mxu1 %v2871_v25 }
  0x3d   :  { %v3110_v26 = vld [vmem:[#allocation4 + $0x300] sm:$0xf]  ;;  %v4102_v29 = vld [vmem:[#allocation4 + $0x4ec] sm:$0xf0]  ;;  %v1433_v33 = vpack.c.b16 %v1181_v19, %v1181_v19  ;;  %v2983_v36 = vor.u32 %v4010_v24, %v2982_v23 }
  0x3e   :  { %v3350_v28 = vld [vmem:[#allocation4 + $0x4e0] sm:$0xf]  ;;  %v4166_v31 = vld [vmem:[#allocation4 + $0x6ec] sm:$0xf0]  ;;  %v3111_v37 = vor.u32 %v4042_v27, %v3110_v26  ;;  %1709 = vmatpush.bf16.msra.mxu0 %v2727_v32 }
  0x3f   :  { %v3606_v30 = vld [vmem:[#allocation4 + $0x6e0] sm:$0xf]  ;;  %v3978_v35 = vld [vmem:[#allocation4 + $0x10c] sm:$0xf0]  ;;  %v3351_v41 = vor.u32 %v4102_v29, %v3350_v28  ;;  %v1691_v49 = vsel %vm1689_vm0, %v1433_v33, 0  ;;  %1735 = vmatpush.bf16.msra.mxu2 %v2983_v36 }
  0x40   :  { %v2854_v34 = vld [vmem:[#allocation4 + $0x100] sm:$0xf]  ;;  %v4134_v39 = vld [vmem:[#allocation4 + $0x5ec] sm:$0xf0]  ;;  %v3607_v42 = vor.u32 %v4166_v31, %v3606_v30  ;;  %1748 = vmatpush.bf16.msra.mxu3 %v3111_v37 }
  0x41   :  { %v3478_v38 = vld [vmem:[#allocation4 + $0x5e0] sm:$0xf]  ;;  %v144_v40 = vld [vmem:[#allocation2] sm:$0xff]  ;;  %v2855_v45 = vor.u32 %v3978_v35, %v2854_v34 }
  0x42   :  { %v3334_v43 = vld [vmem:[#allocation4 + $0x4c0] sm:$0xf]  ;;  %v4098_v44 = vld [vmem:[#allocation4 + $0x4cc] sm:$0xf0]  ;;  %v3479_v50 = vor.u32 %v4134_v39, %v3478_v38  ;;  %148 = vst [vmem:[#allocation1] ss:$4 sm:$0xff] %v144_v40  ;;  %1754 = vmatpush.bf16.msrb.mxu0 %v3351_v41 }
  0x43   :  { %v3590_v46 = vld [vmem:[#allocation4 + $0x6c0] sm:$0xf]  ;;  %v4162_v47 = vld [vmem:[#allocation4 + $0x6cc] sm:$0xf0]  ;;  %1780 = vmatpush.bf16.msrb.mxu2 %v3607_v42  ;;  %v3335_v54 = vor.u32 %v4098_v44, %v3334_v43  ;;  %1722 = vmatpush.bf16.msra.mxu1 %v2855_v45  ;;  %v145_v45 = vld [vmem:[#allocation2 + $0x8] sm:$0xff] }
  0x44   :  { %v3702_v48 = vld [vmem:[#allocation4 + $0x7a0] sm:$0xf]  ;;  %v4190_v51 = vld [vmem:[#allocation4 + $0x7ac] sm:$0xf0]  ;;  %v3591_v55 = vor.u32 %v4162_v47, %v3590_v46  ;;  %1794 = vmatpush.bf16.msrb.mxu3 %v1691_v49  ;;  %150 = vst [vmem:[#allocation1 + $0x20] ss:$4 sm:$0xff] %v145_v45 }
  0x45   :  { %v3462_v52 = vld [vmem:[#allocation4 + $0x5c0] sm:$0xf]  ;;  %v4130_v53 = vld [vmem:[#allocation4 + $0x5cc] sm:$0xf0]  ;;  %v3703_v58 = vor.u32 %v4190_v51, %v3702_v48 }
  0x46   :  { %v3318_v56 = vld [vmem:[#allocation4 + $0x4a0] sm:$0xf]  ;;  %v4094_v57 = vld [vmem:[#allocation4 + $0x4ac] sm:$0xf0]  ;;  %v3463_v62 = vor.u32 %v4130_v53, %v3462_v52  ;;  %1755 = vmatpush.bf16.msrb.mxu0 %v3335_v54 }
  0x47   :  { %v3574_v59 = vld [vmem:[#allocation4 + $0x6a0] sm:$0xf]  ;;  %v4158_v60 = vld [vmem:[#allocation4 + $0x6ac] sm:$0xf0]  ;;  %1767 = vmatpush.bf16.msrb.mxu1 %v3479_v50  ;;  %1781 = vmatpush.bf16.msrb.mxu2 %v3591_v55  ;;  %v3319_v5 = vor.u32 %v4094_v57, %v3318_v56 }
  0x48   :  { %v3686_v61 = vld [vmem:[#allocation4 + $0x780] sm:$0xf]  ;;  %v4186_v63 = vld [vmem:[#allocation4 + $0x78c] sm:$0xf0]  ;;  %v3575_v6 = vor.u32 %v4158_v60, %v3574_v59  ;;  %1795 = vmatpush.bf16.msrb.mxu3 %v3703_v58  ;;  %v3972_v58 = vld [vmem:[#allocation4 + $0xe4] sm:$0xf] }
  0x49   :  { %v3446_v0 = vld [vmem:[#allocation4 + $0x5a0] sm:$0xf]  ;;  %v4126_v1 = vld [vmem:[#allocation4 + $0x5ac] sm:$0xf0]  ;;  %v3687_v10 = vor.u32 %v4186_v63, %v3686_v61  ;;  %v2840_v59 = vld [vmem:[#allocation4 + $0xf0] sm:$0xf0] }
  0x4a   :  { %v3302_v2 = vld [vmem:[#allocation4 + $0x480] sm:$0xf]  ;;  %v4090_v3 = vld [vmem:[#allocation4 + $0x48c] sm:$0xf0]  ;;  %v3447_v13 = vor.u32 %v4126_v1, %v3446_v0  ;;  %1756 = vmatpush.bf16.msrb.mxu0 %v3319_v5  ;;  %v3968_v5 = vld [vmem:[#allocation4 + $0xc4] sm:$0xf] }
  0x4b   :  { %v3558_v4 = vld [vmem:[#allocation4 + $0x680] sm:$0xf]  ;;  %v4154_v7 = vld [vmem:[#allocation4 + $0x68c] sm:$0xf0]  ;;  %1768 = vmatpush.bf16.msrb.mxu1 %v3463_v62  ;;  %1782 = vmatpush.bf16.msrb.mxu2 %v3575_v6  ;;  %v3303_v23 = vor.u32 %v4090_v3, %v3302_v2  ;;  %v2824_v6 = vld [vmem:[#allocation4 + $0xd0] sm:$0xf0] }
  0x4c   :  { %v3670_v8 = vld [vmem:[#allocation4 + $0x760] sm:$0xf]  ;;  %v4182_v9 = vld [vmem:[#allocation4 + $0x76c] sm:$0xf0]  ;;  %v3559_v24 = vor.u32 %v4154_v7, %v3558_v4  ;;  %1796 = vmatpush.bf16.msrb.mxu3 %v3687_v10  ;;  %v4004_v7 = vld [vmem:[#allocation4 + $0x1e4] sm:$0xf] }
  0x4d   :  { %v153_v11 = vld.sshfl [vmem:[#allocation1 + $0x10] sm:$0xff pattern:$0x73625140]  ;;  %v151_v12 = vld.sshfl [vmem:[#allocation1] sm:$0xff pattern:$0x73625140]  ;;  %v3671_v26 = vor.u32 %v4182_v9, %v3670_v8  ;;  %v2843_v9 = vor.u32 %v3972_v58, %v2840_v59 }
  0x4e   :  { %v4561_v14 = vpack.c.bf16 %v153_v11, %v153_v11  ;;  %v4563_v15 = vpack.c.bf16 %v151_v12, %v151_v12  ;;  %v154_v17 = vld.sshfl [vmem:[#allocation1 + $0x18] sm:$0xff pattern:$0x73625140]  ;;  %v152_v18 = vld.sshfl [vmem:[#allocation1 + $0x8] sm:$0xff pattern:$0x73625140]  ;;  %1757 = vmatpush.bf16.msrb.mxu0 %v3303_v23 }
  0x4f   :  { %v3430_v19 = vld [vmem:[#allocation4 + $0x580] sm:$0xf]  ;;  %v4122_v20 = vld [vmem:[#allocation4 + $0x58c] sm:$0xf0]  ;;  %v4565_v21 = vpack.c.bf16 %v154_v17, %v154_v17  ;;  %v4567_v22 = vpack.c.bf16 %v152_v18, %v152_v18  ;;  %1769 = vmatpush.bf16.msrb.mxu1 %v3447_v13  ;;  %1783 = vmatpush.bf16.msrb.mxu2 %v3559_v24  ;;  %v2968_v8 = vld [vmem:[#allocation4 + $0x1f0] sm:$0xf0] }
  0x50   :  { %v3286_v25 = vld [vmem:[#allocation4 + $0x460] sm:$0xf]  ;;  %1736 = vmatmul.bf16.vlgmr.msra.gmra.mxu2 %v4561_v14  ;;  %v4086_v27 = vld [vmem:[#allocation4 + $0x46c] sm:$0xf0]  ;;  %v3431_v30 = vor.u32 %v4122_v20, %v3430_v19  ;;  %1710 = vmatmul.bf16.vlgmr.msra.gmra.mxu0 %v4563_v15  ;;  %v4068_v11 = vld [vmem:[#allocation4 + $0x3e4] sm:$0xf] }
  0x51   :  { %v3542_v28 = vld [vmem:[#allocation4 + $0x660] sm:$0xf]  ;;  %v4150_v29 = vld [vmem:[#allocation4 + $0x66c] sm:$0xf0]  ;;  %1749 = vmatmul.bf16.vlgmr.msra.gmra.mxu3 %v4565_v21  ;;  %1723 = vmatmul.bf16.vlgmr.msra.gmra.mxu1 %v4567_v22  ;;  %v3287_v35 = vor.u32 %v4086_v27, %v3286_v25  ;;  %v3224_v12 = vld [vmem:[#allocation4 + $0x3f0] sm:$0xf0] }
  0x52   :  { %v3654_v31 = vld [vmem:[#allocation4 + $0x740] sm:$0xf]  ;;  %v4178_v32 = vld [vmem:[#allocation4 + $0x74c] sm:$0xf0]  ;;  %v3543_v36 = vor.u32 %v4150_v29, %v3542_v28  ;;  %1797 = vmatpush.bf16.msrb.mxu3 %v3671_v26  ;;  %v4036_v18 = vld [vmem:[#allocation4 + $0x2e4] sm:$0xf]  ;;  %v2971_v26 = vor.u32 %v4004_v7, %v2968_v8  ;;  %v3227_v27 = vor.u32 %v4068_v11, %v3224_v12 }
  0x53   :  { %v3414_v33 = vld [vmem:[#allocation4 + $0x560] sm:$0xf]  ;;  %v4118_v34 = vld [vmem:[#allocation4 + $0x56c] sm:$0xf0]  ;;  %v3655_v38 = vor.u32 %v4178_v32, %v3654_v31  ;;  %1770 = vmatpush.bf16.msrb.mxu1 %v3431_v30  ;;  %1758 = vmatpush.bf16.msrb.mxu0 %v3287_v35  ;;  %v3096_v19 = vld [vmem:[#allocation4 + $0x2f0] sm:$0xf0]  ;;  %v2827_v31 = vor.u32 %v3968_v5, %v2824_v6 }
  0x54   :  { %v3270_v37 = vld [vmem:[#allocation4 + $0x440] sm:$0xf]  ;;  %v4082_v39 = vld [vmem:[#allocation4 + $0x44c] sm:$0xf0]  ;;  %v3415_v42 = vor.u32 %v4118_v34, %v3414_v33  ;;  %1784 = vmatpush.bf16.msrb.mxu2 %v3543_v36  ;;  %v4000_v25 = vld [vmem:[#allocation4 + $0x1c4] sm:$0xf] }
  0x55   :  { %v3526_v40 = vld [vmem:[#allocation4 + $0x640] sm:$0xf]  ;;  %v4146_v41 = vld [vmem:[#allocation4 + $0x64c] sm:$0xf0]  ;;  %v3271_v48 = vor.u32 %v4082_v39, %v3270_v37  ;;  %v3964_v30 = vld [vmem:[#allocation4 + $0xa4] sm:$0xf]  ;;  %v3099_v37 = vor.u32 %v4036_v18, %v3096_v19 }
  0x56   :  { %v3638_v43 = vld [vmem:[#allocation4 + $0x720] sm:$0xf]  ;;  %v4174_v44 = vld [vmem:[#allocation4 + $0x72c] sm:$0xf0]  ;;  %v3527_v49 = vor.u32 %v4146_v41, %v3526_v40  ;;  %1798 = vmatpush.bf16.msrb.mxu3 %v3655_v38  ;;  %v2952_v33 = vld [vmem:[#allocation4 + $0x1d0] sm:$0xf0] }
  0x57   :  { %v3398_v46 = vld [vmem:[#allocation4 + $0x540] sm:$0xf]  ;;  %v4114_v47 = vld [vmem:[#allocation4 + $0x54c] sm:$0xf0]  ;;  %v3639_v52 = vor.u32 %v4174_v44, %v3638_v43  ;;  %1771 = vmatpush.bf16.msrb.mxu1 %v3415_v42  ;;  %1759 = vmatpush.bf16.msrb.mxu0 %v3271_v48  ;;  %v4064_v34 = vld [vmem:[#allocation4 + $0x3c4] sm:$0xf]  ;;  %v2955_v44 = vor.u32 %v4000_v25, %v2952_v33 }
  0x58   :  { %v3254_v50 = vld [vmem:[#allocation4 + $0x420] sm:$0xf]  ;;  %v4078_v51 = vld [vmem:[#allocation4 + $0x42c] sm:$0xf0]  ;;  %v3399_v56 = vor.u32 %v4114_v47, %v3398_v46  ;;  %1785 = vmatpush.bf16.msrb.mxu2 %v3527_v49  ;;  %v3208_v35 = vld [vmem:[#allocation4 + $0x3d0] sm:$0xf0] }
  0x59   :  { %v3510_v53 = vld [vmem:[#allocation4 + $0x620] sm:$0xf]  ;;  %v4142_v54 = vld [vmem:[#allocation4 + $0x62c] sm:$0xf0]  ;;  %v3255_v63 = vor.u32 %v4078_v51, %v3254_v50  ;;  %v2808_v38 = vld [vmem:[#allocation4 + $0xb0] sm:$0xf0]  ;;  %v3211_v45 = vor.u32 %v4064_v34, %v3208_v35 }
  0x5a   :  { %v3622_v55 = vld [vmem:[#allocation4 + $0x700] sm:$0xf]  ;;  %v4170_v57 = vld [vmem:[#allocation4 + $0x70c] sm:$0xf0]  ;;  %v3511_v0 = vor.u32 %v4142_v54, %v3510_v53  ;;  %1799 = vmatpush.bf16.msrb.mxu3 %v3639_v52  ;;  %v4032_v42 = vld [vmem:[#allocation4 + $0x2c4] sm:$0xf]  ;;  %v2811_v47 = vor.u32 %v3964_v30, %v2808_v38  ;;  %v1182_v38 = vunpack.c.h.b16 %v4557_v16 }
  0x5b   :  { %v3382_v60 = vld [vmem:[#allocation4 + $0x520] sm:$0xf]  ;;  %v4110_v61 = vld [vmem:[#allocation4 + $0x52c] sm:$0xf0]  ;;  %v3623_v4 = vor.u32 %v4170_v57, %v3622_v55  ;;  %1772 = vmatpush.bf16.msrb.mxu1 %v3399_v56  ;;  %1760 = vmatpush.bf16.msrb.mxu0 %v3255_v63  ;;  %v3080_v43 = vld [vmem:[#allocation4 + $0x2d0] sm:$0xf0] }
  0x5c   :  { %v3238_v62 = vld [vmem:[#allocation4 + $0x400] sm:$0xf]  ;;  %v4074_v1 = vld [vmem:[#allocation4 + $0x40c] sm:$0xf0]  ;;  %v3383_v10 = vor.u32 %v4110_v61, %v3382_v60  ;;  %1786 = vmatpush.bf16.msrb.mxu2 %v3511_v0  ;;  %v3996_v46 = vld [vmem:[#allocation4 + $0x1a4] sm:$0xf]  ;;  %v3083_v52 = vor.u32 %v4032_v42, %v3080_v43 }
  0x5d   :  { %v3494_v2 = vld [vmem:[#allocation4 + $0x600] sm:$0xf]  ;;  %v4138_v3 = vld [vmem:[#allocation4 + $0x60c] sm:$0xf0]  ;;  %v3239_v20 = vor.u32 %v4074_v1, %v3238_v62  ;;  %v2936_v49 = vld [vmem:[#allocation4 + $0x1b0] sm:$0xf0] }
  0x5e   :  { %v3366_v13 = vld [vmem:[#allocation4 + $0x500] sm:$0xf]  ;;  %v4106_v17 = vld [vmem:[#allocation4 + $0x50c] sm:$0xf0]  ;;  %v3495_v23 = vor.u32 %v4138_v3, %v3494_v2  ;;  %1800 = vmatpush.bf16.msrb.mxu3 %v3623_v4  ;;  %v4060_v50 = vld [vmem:[#allocation4 + $0x3a4] sm:$0xf]  ;;  %v2939_v57 = vor.u32 %v3996_v46, %v2936_v49 }
  0x5f   :  { %v157_v24 = vld.sshfl [vmem:[#allocation1 + $0x30] sm:$0xff pattern:$0x73625140]  ;;  %v155_v28 = vld.sshfl [vmem:[#allocation1 + $0x20] sm:$0xff pattern:$0x73625140]  ;;  %1773 = vmatpush.bf16.msrb.mxu1 %v3383_v10  ;;  %v3367_v32 = vor.u32 %v4106_v17, %v3366_v13  ;;  %1761 = vmatpush.bf16.msrb.mxu0 %v3239_v20 }
  0x60   :  { %v158_v29 = vld.sshfl [vmem:[#allocation1 + $0x38] sm:$0xff pattern:$0x73625140]  ;;  %v4573_v36 = vpack.c.bf16 %v157_v24, %v157_v24  ;;  %v156_v39 = vld.sshfl [vmem:[#allocation1 + $0x28] sm:$0xff pattern:$0x73625140]  ;;  %1787 = vmatpush.bf16.msrb.mxu2 %v3495_v23  ;;  %v4575_v40 = vpack.c.bf16 %v155_v28, %v155_v28 }
  0x61   :  { %v4577_v41 = vpack.c.bf16 %v158_v29, %v158_v29  ;;  %v4579_v48 = vpack.c.bf16 %v156_v39, %v156_v39  ;;  %v3192_v51 = vld [vmem:[#allocation4 + $0x3b0] sm:$0xf0]  ;;  %v3960_v53 = vld [vmem:[#allocation4 + $0x84] sm:$0xf] }
  0x62   :  { %1806 = vmatpush.bf16.msra.mxu3 %v2843_v9  ;;  %v2792_v54 = vld [vmem:[#allocation4 + $0x90] sm:$0xf0]  ;;  %1762 = vmatmul.bf16.vlgmr.msrb.gmra.mxu0 %v4575_v40  ;;  %v4028_v55 = vld [vmem:[#allocation4 + $0x2a4] sm:$0xf]  ;;  %v3195_v58 = vor.u32 %v4060_v50, %v3192_v51 }
  0x63   :  { %1819 = vmatpush.bf16.msra.mxu0 %v2971_v26  ;;  %1774 = vmatpush.bf16.msrb.mxu1 %v3367_v32  ;;  %v3064_v56 = vld [vmem:[#allocation4 + $0x2b0] sm:$0xf0]  ;;  %v3992_v59 = vld [vmem:[#allocation4 + $0x184] sm:$0xf]  ;;  %v2795_v60 = vor.u32 %v3960_v53, %v2792_v54 }
  0x64   :  { %1845 = vmatpush.bf16.msra.mxu2 %v3227_v27  ;;  %3716 = vmatmul.msk.bf16.vlgmr.msrb.gmra.mxu3 %vm1685_vm1, %v4577_v41  ;;  %v2920_v61 = vld [vmem:[#allocation4 + $0x190] sm:$0xf0]  ;;  %v4056_v62 = vld [vmem:[#allocation4 + $0x384] sm:$0xf]  ;;  %v3067_v0 = vor.u32 %v4028_v55, %v3064_v56 }
  0x65   :  { %1788 = vmatmul.bf16.vlgmr.msrb.gmra.mxu2 %v4573_v36  ;;  %v3176_v63 = vld [vmem:[#allocation4 + $0x390] sm:$0xf0]  ;;  %v3956_v1 = vld [vmem:[#allocation4 + $0x64] sm:$0xf]  ;;  %v2923_v5 = vor.u32 %v3992_v59, %v2920_v61  ;;  %v1434_v59 = vpack.c.b16 %v1182_v38, %v1182_v38 }
  0x66   :  { %1807 = vmatpush.bf16.msra.mxu3 %v2827_v31  ;;  %1775 = vmatmul.bf16.vlgmr.msrb.gmra.mxu1 %v4579_v48  ;;  %v2776_v2 = vld [vmem:[#allocation4 + $0x70] sm:$0xf0]  ;;  %v4024_v3 = vld [vmem:[#allocation4 + $0x284] sm:$0xf]  ;;  %v3179_v6 = vor.u32 %v4056_v62, %v3176_v63 }
  0x67   :  { %1832 = vmatpush.bf16.msra.mxu1 %v3099_v37  ;;  %1820 = vmatpush.bf16.msra.mxu0 %v2955_v44  ;;  %v3048_v4 = vld [vmem:[#allocation4 + $0x290] sm:$0xf0]  ;;  %v3988_v7 = vld [vmem:[#allocation4 + $0x164] sm:$0xf]  ;;  %v2779_v8 = vor.u32 %v3956_v1, %v2776_v2 }
  0x68   :  { %1846 = vmatpush.bf16.msra.mxu2 %v3211_v45  ;;  %v2904_v9 = vld [vmem:[#allocation4 + $0x170] sm:$0xf0]  ;;  %v4052_v10 = vld [vmem:[#allocation4 + $0x364] sm:$0xf]  ;;  %v3051_v12 = vor.u32 %v4024_v3, %v3048_v4 }
  0x69   :  { %v3160_v11 = vld [vmem:[#allocation4 + $0x370] sm:$0xf0]  ;;  %v3952_v13 = vld [vmem:[#allocation4 + $0x44] sm:$0xf]  ;;  %v2907_v20 = vor.u32 %v3988_v7, %v2904_v9  ;;  %v1694_v9 = vsel %vm1689_vm0, %v1434_v59, 0 }
  0x6a   :  { %1808 = vmatpush.bf16.msra.mxu3 %v2811_v47  ;;  %v2760_v17 = vld [vmem:[#allocation4 + $0x50] sm:$0xf0]  ;;  %v4020_v18 = vld [vmem:[#allocation4 + $0x264] sm:$0xf]  ;;  %v3163_v23 = vor.u32 %v4052_v10, %v3160_v11 }
  0x6b   :  { %1833 = vmatpush.bf16.msra.mxu1 %v3083_v52  ;;  %1821 = vmatpush.bf16.msra.mxu0 %v2939_v57  ;;  %v3032_v19 = vld [vmem:[#allocation4 + $0x270] sm:$0xf0]  ;;  %v3984_v24 = vld [vmem:[#allocation4 + $0x144] sm:$0xf]  ;;  %v2763_v25 = vor.u32 %v3952_v13, %v2760_v17 }
  0x6c   :  { %1847 = vmatpush.bf16.msra.mxu2 %v3195_v58  ;;  %v2888_v26 = vld [vmem:[#allocation4 + $0x150] sm:$0xf0]  ;;  %v4048_v27 = vld [vmem:[#allocation4 + $0x344] sm:$0xf]  ;;  %v3035_v29 = vor.u32 %v4020_v18, %v3032_v19 }
  0x6d   :  { %v3144_v28 = vld [vmem:[#allocation4 + $0x350] sm:$0xf0]  ;;  %v3948_v30 = vld [vmem:[#allocation4 + $0x24] sm:$0xf]  ;;  %v2891_v34 = vor.u32 %v3984_v24, %v2888_v26 }
  0x6e   :  { %1809 = vmatpush.bf16.msra.mxu3 %v2795_v60  ;;  %v2744_v31 = vld [vmem:[#allocation4 + $0x30] sm:$0xf0]  ;;  %v4016_v32 = vld [vmem:[#allocation4 + $0x244] sm:$0xf]  ;;  %v3147_v35 = vor.u32 %v4048_v27, %v3144_v28 }
  0x6f   :  { %1834 = vmatpush.bf16.msra.mxu1 %v3067_v0  ;;  %1822 = vmatpush.bf16.msra.mxu0 %v2923_v5  ;;  %v3016_v33 = vld [vmem:[#allocation4 + $0x250] sm:$0xf0]  ;;  %v3980_v37 = vld [vmem:[#allocation4 + $0x124] sm:$0xf]  ;;  %v2747_v39 = vor.u32 %v3948_v30, %v2744_v31 }
  0x70   :  { %1848 = vmatpush.bf16.msra.mxu2 %v3179_v6  ;;  %v2872_v42 = vld [vmem:[#allocation4 + $0x130] sm:$0xf0]  ;;  %v4044_v43 = vld [vmem:[#allocation4 + $0x324] sm:$0xf]  ;;  %v3019_v45 = vor.u32 %v4016_v32, %v3016_v33 }
  0x71   :  { %v3128_v44 = vld [vmem:[#allocation4 + $0x330] sm:$0xf0]  ;;  %v3944_v46 = vld [vmem:[#allocation4 + $0x4] sm:$0xf]  ;;  %v2875_v53 = vor.u32 %v3980_v37, %v2872_v42 }
  0x72   :  { %1810 = vmatpush.bf16.msra.mxu3 %v2779_v8  ;;  %v2728_v47 = vld [vmem:[#allocation4 + $0x10] sm:$0xf0]  ;;  %v4100_v49 = vld [vmem:[#allocation4 + $0x4e4] sm:$0xf]  ;;  %v3131_v54 = vor.u32 %v4044_v43, %v3128_v44 }
  0x73   :  { %1835 = vmatpush.bf16.msra.mxu1 %v3051_v12  ;;  %1823 = vmatpush.bf16.msra.mxu0 %v2907_v20  ;;  %v3352_v50 = vld [vmem:[#allocation4 + $0x4f0] sm:$0xf0]  ;;  %v4012_v51 = vld [vmem:[#allocation4 + $0x224] sm:$0xf]  ;;  %v2731_v16 = vor.u32 %v3944_v46, %v2728_v47 }
  0x74   :  { %1849 = vmatpush.bf16.msra.mxu2 %v3163_v23  ;;  %v3000_v52 = vld [vmem:[#allocation4 + $0x230] sm:$0xf0]  ;;  %v3976_v55 = vld [vmem:[#allocation4 + $0x104] sm:$0xf]  ;;  %v3355_v60 = vor.u32 %v4100_v49, %v3352_v50 }
  0x75   :  { %v2856_v56 = vld [vmem:[#allocation4 + $0x110] sm:$0xf0]  ;;  %v4040_v57 = vld [vmem:[#allocation4 + $0x304] sm:$0xf]  ;;  %v3003_v61 = vor.u32 %v4012_v51, %v3000_v52 }
  0x76   :  { %1811 = vmatpush.bf16.msra.mxu3 %v2763_v25  ;;  %v3112_v58 = vld [vmem:[#allocation4 + $0x310] sm:$0xf0]  ;;  %v4096_v62 = vld [vmem:[#allocation4 + $0x4c4] sm:$0xf]  ;;  %v2859_v4 = vor.u32 %v3976_v55, %v2856_v56 }
  0x77   :  { %1836 = vmatpush.bf16.msra.mxu1 %v3035_v29  ;;  %1824 = vmatpush.bf16.msra.mxu0 %v2891_v34  ;;  %v4132_v63 = vld [vmem:[#allocation4 + $0x5e4] sm:$0xf]  ;;  %v3480_v0 = vld [vmem:[#allocation4 + $0x5f0] sm:$0xf0]  ;;  %v3115_v5 = vor.u32 %v4040_v57, %v3112_v58 }
  0x78   :  { %1850 = vmatpush.bf16.msra.mxu2 %v3147_v35  ;;  %v3336_v1 = vld [vmem:[#allocation4 + $0x4d0] sm:$0xf0]  ;;  %v4008_v2 = vld [vmem:[#allocation4 + $0x204] sm:$0xf]  ;;  %v3483_v8 = vor.u32 %v4132_v63, %v3480_v0 }
  0x79   :  { %v2984_v3 = vld [vmem:[#allocation4 + $0x210] sm:$0xf0]  ;;  %v4164_v6 = vld [vmem:[#allocation4 + $0x6e4] sm:$0xf]  ;;  %v3339_v11 = vor.u32 %v4096_v62, %v3336_v1 }
  0x7a   :  { %1812 = vmatpush.bf16.msra.mxu3 %v2747_v39  ;;  %v3608_v7 = vld [vmem:[#allocation4 + $0x6f0] sm:$0xf0]  ;;  %v4128_v10 = vld [vmem:[#allocation4 + $0x5c4] sm:$0xf]  ;;  %v2987_v12 = vor.u32 %v4008_v2, %v2984_v3 }
  0x7b   :  { %1837 = vmatpush.bf16.msra.mxu1 %v3019_v45  ;;  %1825 = vmatpush.bf16.msra.mxu0 %v2875_v53  ;;  %v3464_v13 = vld [vmem:[#allocation4 + $0x5d0] sm:$0xf0]  ;;  %v4188_v17 = vld [vmem:[#allocation4 + $0x7a4] sm:$0xf]  ;;  %v3611_v19 = vor.u32 %v4164_v6, %v3608_v7 }
  0x7c   :  { %1851 = vmatpush.bf16.msra.mxu2 %v3131_v54  ;;  %v3704_v18 = vld [vmem:[#allocation4 + $0x7b0] sm:$0xf0]  ;;  %v4092_v20 = vld [vmem:[#allocation4 + $0x4a4] sm:$0xf]  ;;  %v3467_v26 = vor.u32 %v4128_v10, %v3464_v13 }
  0x7d   :  { %v3320_v23 = vld [vmem:[#allocation4 + $0x4b0] sm:$0xf0]  ;;  %v4160_v24 = vld [vmem:[#allocation4 + $0x6c4] sm:$0xf]  ;;  %v3707_v27 = vor.u32 %v4188_v17, %v3704_v18 }
  0x7e   :  { %1813 = vmatpush.bf16.msra.mxu3 %v2731_v16  ;;  %v3592_v25 = vld [vmem:[#allocation4 + $0x6d0] sm:$0xf0]  ;;  %v4124_v28 = vld [vmem:[#allocation4 + $0x5a4] sm:$0xf]  ;;  %v3323_v29 = vor.u32 %v4092_v20, %v3320_v23 }
  0x7f   :  { %1838 = vmatpush.bf16.msra.mxu1 %v3003_v61  ;;  %1826 = vmatpush.bf16.msra.mxu0 %v2859_v4  ;;  %v3448_v30 = vld [vmem:[#allocation4 + $0x5b0] sm:$0xf0]  ;;  %v4184_v31 = vld [vmem:[#allocation4 + $0x784] sm:$0xf]  ;;  %v3595_v33 = vor.u32 %v4160_v24, %v3592_v25 }
  0x80   :  { %1852 = vmatpush.bf16.msra.mxu2 %v3115_v5  ;;  %v3688_v32 = vld [vmem:[#allocation4 + $0x790] sm:$0xf0]  ;;  %v4088_v34 = vld [vmem:[#allocation4 + $0x484] sm:$0xf]  ;;  %v3451_v39 = vor.u32 %v4124_v28, %v3448_v30  ;;  %v2846_v28 = vld [vmem:[#allocation4 + $0xe8] sm:$0xf] }
  0x81   :  { %v3304_v35 = vld [vmem:[#allocation4 + $0x490] sm:$0xf0]  ;;  %1814 = vmatmul.bf16.vlgmr.msra.gmra.mxu3 %v4563_v15  ;;  %v4156_v37 = vld [vmem:[#allocation4 + $0x6a4] sm:$0xf]  ;;  %v3691_v42 = vor.u32 %v4184_v31, %v3688_v32  ;;  %v2974_v30 = vld [vmem:[#allocation4 + $0x1e8] sm:$0xf] }
  0x82   :  { %1858 = vmatpush.bf16.msrb.mxu3 %v3355_v60  ;;  %v3576_v38 = vld [vmem:[#allocation4 + $0x6b0] sm:$0xf0]  ;;  %1827 = vmatmul.bf16.vlgmr.msra.gmra.mxu0 %v4567_v22  ;;  %v4120_v43 = vld [vmem:[#allocation4 + $0x584] sm:$0xf]  ;;  %v3307_v44 = vor.u32 %v4088_v34, %v3304_v35  ;;  %v4007_v31 = vld [vmem:[#allocation4 + $0x1f4] sm:$0xf0] }
  0x83   :  { %1871 = vmatpush.bf16.msrb.mxu0 %v3483_v8  ;;  %1839 = vmatpush.bf16.msra.mxu1 %v2987_v12  ;;  %v3432_v45 = vld [vmem:[#allocation4 + $0x590] sm:$0xf0]  ;;  %v4180_v46 = vld [vmem:[#allocation4 + $0x764] sm:$0xf]  ;;  %v3579_v49 = vor.u32 %v4156_v37, %v3576_v38 }
  0x84   :  { %1898 = vmatpush.bf16.msrb.mxu2 %v1694_v9  ;;  %v3672_v47 = vld [vmem:[#allocation4 + $0x770] sm:$0xf0]  ;;  %v4084_v50 = vld [vmem:[#allocation4 + $0x464] sm:$0xf]  ;;  %v3435_v55 = vor.u32 %v4120_v43, %v3432_v45  ;;  %v2830_v43 = vld [vmem:[#allocation4 + $0xc8] sm:$0xf]  ;;  %v2975_v45 = vor.u32 %v4007_v31, %v2974_v30 }
  0x85   :  { %1853 = vmatmul.bf16.vlgmr.msra.gmra.mxu2 %v4565_v21  ;;  %v3288_v51 = vld [vmem:[#allocation4 + $0x470] sm:$0xf0]  ;;  %v4152_v52 = vld [vmem:[#allocation4 + $0x684] sm:$0xf]  ;;  %v3675_v16 = vor.u32 %v4180_v46, %v3672_v47  ;;  %v2958_v47 = vld [vmem:[#allocation4 + $0x1c8] sm:$0xf] }
  0x86   :  { %1859 = vmatpush.bf16.msrb.mxu3 %v3339_v11  ;;  %1840 = vmatmul.bf16.vlgmr.msra.gmra.mxu1 %v4561_v14  ;;  %v3560_v53 = vld [vmem:[#allocation4 + $0x690] sm:$0xf0]  ;;  %v4116_v54 = vld [vmem:[#allocation4 + $0x564] sm:$0xf]  ;;  %v3291_v59 = vor.u32 %v4084_v50, %v3288_v51  ;;  %v4039_v50 = vld [vmem:[#allocation4 + $0x2f4] sm:$0xf0] }
  0x87   :  { %1884 = vmatpush.bf16.msrb.mxu1 %v3611_v19  ;;  %1872 = vmatpush.bf16.msrb.mxu0 %v3467_v26  ;;  %v3416_v56 = vld [vmem:[#allocation4 + $0x570] sm:$0xf0]  ;;  %v4176_v57 = vld [vmem:[#allocation4 + $0x744] sm:$0xf]  ;;  %v3563_v60 = vor.u32 %v4152_v52, %v3560_v53  ;;  %v4003_v51 = vld [vmem:[#allocation4 + $0x1d4] sm:$0xf0] }
  0x88   :  { %1899 = vmatpush.bf16.msrb.mxu2 %v3707_v27  ;;  %v3656_v58 = vld [vmem:[#allocation4 + $0x750] sm:$0xf0]  ;;  %v4080_v61 = vld [vmem:[#allocation4 + $0x444] sm:$0xf]  ;;  %v3419_v1 = vor.u32 %v4116_v54, %v3416_v56  ;;  %v2910_v30 = vld [vmem:[#allocation4 + $0x168] sm:$0xf] }
  0x89   :  { %v3272_v62 = vld [vmem:[#allocation4 + $0x450] sm:$0xf0]  ;;  %v4148_v63 = vld [vmem:[#allocation4 + $0x664] sm:$0xf]  ;;  %v3659_v2 = vor.u32 %v4176_v57, %v3656_v58  ;;  %v2814_v58 = vld [vmem:[#allocation4 + $0xa8] sm:$0xf] }
  0x8a   :  { %1860 = vmatpush.bf16.msrb.mxu3 %v3323_v29  ;;  %v3544_v0 = vld [vmem:[#allocation4 + $0x670] sm:$0xf0]  ;;  %v4112_v3 = vld [vmem:[#allocation4 + $0x544] sm:$0xf]  ;;  %v3275_v4 = vor.u32 %v4080_v61, %v3272_v62  ;;  %v3975_v29 = vld [vmem:[#allocation4 + $0xf4] sm:$0xf0] }
  0x8b   :  { %1885 = vmatpush.bf16.msrb.mxu1 %v3595_v33  ;;  %1873 = vmatpush.bf16.msrb.mxu0 %v3451_v39  ;;  %v3400_v5 = vld [vmem:[#allocation4 + $0x550] sm:$0xf0]  ;;  %v4172_v6 = vld [vmem:[#allocation4 + $0x724] sm:$0xf]  ;;  %v3547_v8 = vor.u32 %v4148_v63, %v3544_v0  ;;  %v2847_v39 = vor.u32 %v3975_v29, %v2846_v28  ;;  %v3967_v61 = vld [vmem:[#allocation4 + $0xb4] sm:$0xf0] }
  0x8c   :  { %1900 = vmatpush.bf16.msrb.mxu2 %v3691_v42  ;;  %v3640_v7 = vld [vmem:[#allocation4 + $0x730] sm:$0xf0]  ;;  %v4076_v9 = vld [vmem:[#allocation4 + $0x424] sm:$0xf]  ;;  %v3403_v13 = vor.u32 %v4112_v3, %v3400_v5  ;;  %v3086_v62 = vld [vmem:[#allocation4 + $0x2c8] sm:$0xf]  ;;  %v2815_v5 = vor.u32 %v3967_v61, %v2814_v58 }
  0x8d   :  { %v3256_v10 = vld [vmem:[#allocation4 + $0x430] sm:$0xf0]  ;;  %v4144_v11 = vld [vmem:[#allocation4 + $0x644] sm:$0xf]  ;;  %v3643_v17 = vor.u32 %v4172_v6, %v3640_v7  ;;  %v4035_v63 = vld [vmem:[#allocation4 + $0x2d4] sm:$0xf0] }
  0x8e   :  { %1861 = vmatpush.bf16.msrb.mxu3 %v3307_v44  ;;  %v3528_v12 = vld [vmem:[#allocation4 + $0x650] sm:$0xf0]  ;;  %v4072_v18 = vld [vmem:[#allocation4 + $0x404] sm:$0xf]  ;;  %v3259_v23 = vor.u32 %v4076_v9, %v3256_v10  ;;  %v3971_v44 = vld [vmem:[#allocation4 + $0xd4] sm:$0xf0]  ;;  %v3087_v6 = vor.u32 %v4035_v63, %v3086_v62 }
  0x8f   :  { %1886 = vmatpush.bf16.msrb.mxu1 %v3579_v49  ;;  %1874 = vmatpush.bf16.msrb.mxu0 %v3435_v55  ;;  %v3240_v19 = vld [vmem:[#allocation4 + $0x410] sm:$0xf0]  ;;  %v4108_v20 = vld [vmem:[#allocation4 + $0x524] sm:$0xf]  ;;  %v3531_v27 = vor.u32 %v4144_v11, %v3528_v12  ;;  %v3102_v49 = vld [vmem:[#allocation4 + $0x2e8] sm:$0xf]  ;;  %v2831_v56 = vor.u32 %v3971_v44, %v2830_v43 }
  0x90   :  { %1901 = vmatpush.bf16.msrb.mxu2 %v3675_v16  ;;  %v3384_v24 = vld [vmem:[#allocation4 + $0x530] sm:$0xf0]  ;;  %v4168_v25 = vld [vmem:[#allocation4 + $0x704] sm:$0xf]  ;;  %v3243_v38 = vor.u32 %v4072_v18, %v3240_v19  ;;  %v3230_v55 = vld [vmem:[#allocation4 + $0x3e8] sm:$0xf]  ;;  %v3103_v57 = vor.u32 %v4039_v50, %v3102_v49 }
  0x91   :  { %v3624_v26 = vld [vmem:[#allocation4 + $0x710] sm:$0xf0]  ;;  %v4140_v32 = vld [vmem:[#allocation4 + $0x624] sm:$0xf]  ;;  %v3387_v34 = vor.u32 %v4108_v20, %v3384_v24  ;;  %v4071_v16 = vld [vmem:[#allocation4 + $0x3f4] sm:$0xf0] }
  0x92   :  { %1862 = vmatpush.bf16.msrb.mxu3 %v3291_v59  ;;  %v3512_v33 = vld [vmem:[#allocation4 + $0x630] sm:$0xf0]  ;;  %v3627_v35 = vor.u32 %v4168_v25, %v3624_v26  ;;  %v4104_v37 = vld [vmem:[#allocation4 + $0x504] sm:$0xf]  ;;  %v2959_v59 = vor.u32 %v4003_v51, %v2958_v47  ;;  %v3231_v0 = vor.u32 %v4071_v16, %v3230_v55  ;;  %v3214_v3 = vld [vmem:[#allocation4 + $0x3c8] sm:$0xf] }
  0x93   :  { %1887 = vmatpush.bf16.msrb.mxu1 %v3563_v60  ;;  %1875 = vmatpush.bf16.msrb.mxu0 %v3419_v1  ;;  %v3368_v42 = vld [vmem:[#allocation4 + $0x510] sm:$0xf0]  ;;  %v3515_v46 = vor.u32 %v4140_v32, %v3512_v33  ;;  %v4136_v52 = vld [vmem:[#allocation4 + $0x604] sm:$0xf]  ;;  %v2942_v1 = vld [vmem:[#allocation4 + $0x1a8] sm:$0xf] }
  0x94   :  { %1902 = vmatpush.bf16.msrb.mxu2 %v3659_v2  ;;  %v3496_v53 = vld [vmem:[#allocation4 + $0x610] sm:$0xf0]  ;;  %v3371_v54 = vor.u32 %v4104_v37, %v3368_v42  ;;  %v3999_v2 = vld [vmem:[#allocation4 + $0x1b4] sm:$0xf0]  ;;  %v2798_v7 = vld [vmem:[#allocation4 + $0x88] sm:$0xf] }
  0x95   :  { %v3499_v60 = vor.u32 %v4136_v52, %v3496_v53  ;;  %v3963_v9 = vld [vmem:[#allocation4 + $0x94] sm:$0xf0]  ;;  %v3070_v10 = vld [vmem:[#allocation4 + $0x2a8] sm:$0xf] }
  0x96   :  { %1863 = vmatpush.bf16.msrb.mxu3 %v3275_v4  ;;  %v4067_v4 = vld [vmem:[#allocation4 + $0x3d4] sm:$0xf0]  ;;  %v3198_v18 = vld [vmem:[#allocation4 + $0x3a8] sm:$0xf]  ;;  %v2799_v20 = vor.u32 %v3963_v9, %v2798_v7 }
  0x97   :  { %1888 = vmatpush.bf16.msrb.mxu1 %v3547_v8  ;;  %1876 = vmatpush.bf16.msrb.mxu0 %v3403_v13  ;;  %v2943_v8 = vor.u32 %v3999_v2, %v2942_v1  ;;  %v4031_v11 = vld [vmem:[#allocation4 + $0x2b4] sm:$0xf0]  ;;  %v3215_v12 = vor.u32 %v4067_v4, %v3214_v3  ;;  %v2926_v13 = vld [vmem:[#allocation4 + $0x188] sm:$0xf] }
  0x98   :  { %1903 = vmatpush.bf16.msrb.mxu2 %v3643_v17  ;;  %v3995_v17 = vld [vmem:[#allocation4 + $0x194] sm:$0xf0]  ;;  %v2782_v24 = vld [vmem:[#allocation4 + $0x68] sm:$0xf] }
  0x99   :  { %v4063_v19 = vld [vmem:[#allocation4 + $0x3b4] sm:$0xf0]  ;;  %v2927_v25 = vor.u32 %v3995_v17, %v2926_v13  ;;  %v3182_v32 = vld [vmem:[#allocation4 + $0x388] sm:$0xf] }
  0x9a   :  { %1864 = vmatpush.bf16.msrb.mxu3 %v3259_v23  ;;  %v3071_v23 = vor.u32 %v4031_v11, %v3070_v10  ;;  %v3959_v26 = vld [vmem:[#allocation4 + $0x74] sm:$0xf0]  ;;  %v3199_v29 = vor.u32 %v4063_v19, %v3198_v18  ;;  %v2766_v37 = vld [vmem:[#allocation4 + $0x48] sm:$0xf] }
  0x9b   :  { %1889 = vmatpush.bf16.msrb.mxu1 %v3531_v27  ;;  %1877 = vmatpush.bf16.msrb.mxu0 %v3387_v34  ;;  %v3054_v27 = vld [vmem:[#allocation4 + $0x288] sm:$0xf]  ;;  %v4027_v28 = vld [vmem:[#allocation4 + $0x294] sm:$0xf0]  ;;  %v2783_v34 = vor.u32 %v3959_v26, %v2782_v24 }
  0x9c   :  { %1904 = vmatpush.bf16.msrb.mxu2 %v3627_v35  ;;  %v3991_v31 = vld [vmem:[#allocation4 + $0x174] sm:$0xf0]  ;;  %v3055_v35 = vor.u32 %v4027_v28, %v3054_v27  ;;  %v3038_v42 = vld [vmem:[#allocation4 + $0x268] sm:$0xf] }
  0x9d   :  { %v4059_v33 = vld [vmem:[#allocation4 + $0x394] sm:$0xf0]  ;;  %v3166_v47 = vld [vmem:[#allocation4 + $0x368] sm:$0xf] }
  0x9e   :  { %1865 = vmatpush.bf16.msrb.mxu3 %v3243_v38  ;;  %v2911_v38 = vor.u32 %v3991_v31, %v2910_v30  ;;  %v4023_v43 = vld [vmem:[#allocation4 + $0x274] sm:$0xf0]  ;;  %v3183_v44 = vor.u32 %v4059_v33, %v3182_v32  ;;  %v2750_v52 = vld [vmem:[#allocation4 + $0x28] sm:$0xf] }
  0x9f   :  { %1890 = vmatpush.bf16.msrb.mxu1 %v3515_v46  ;;  %3717 = vmatmul.msk.bf16.vlgmr.msrb.gmra.mxu2 %vm1685_vm1, %v4577_v41  ;;  %v3987_v46 = vld [vmem:[#allocation4 + $0x154] sm:$0xf0]  ;;  %v3039_v51 = vor.u32 %v4023_v43, %v3038_v42  ;;  %v3022_v55 = vld [vmem:[#allocation4 + $0x248] sm:$0xf] }
  0xa0   :  { %1910 = vmatpush.bf16.msra.mxu2 %v2847_v39  ;;  %1878 = vmatpush.bf16.msrb.mxu0 %v3371_v54  ;;  %v3955_v39 = vld [vmem:[#allocation4 + $0x54] sm:$0xf0]  ;;  %v2734_v61 = vld [vmem:[#allocation4 + $0x8] sm:$0xf] }
  0xa1   :  { %1866 = vmatmul.bf16.vlgmr.msrb.gmra.mxu3 %v4575_v40  ;;  %v4055_v49 = vld [vmem:[#allocation4 + $0x374] sm:$0xf0]  ;;  %v2767_v50 = vor.u32 %v3955_v39, %v2766_v37  ;;  %v2862_v1 = vld [vmem:[#allocation4 + $0x108] sm:$0xf] }
  0xa2   :  { %1923 = vmatpush.bf16.msra.mxu3 %v2975_v45  ;;  %v2894_v45 = vld [vmem:[#allocation4 + $0x148] sm:$0xf]  ;;  %v3951_v54 = vld [vmem:[#allocation4 + $0x34] sm:$0xf0] }
  0xa3   :  { %1891 = vmatpush.bf16.msrb.mxu1 %v3499_v60  ;;  %1879 = vmatmul.bf16.vlgmr.msrb.gmra.mxu0 %v4579_v48  ;;  %v2895_v53 = vor.u32 %v3987_v46, %v2894_v45  ;;  %v4019_v16 = vld [vmem:[#allocation4 + $0x254] sm:$0xf0]  ;;  %v2751_v62 = vor.u32 %v3951_v54, %v2750_v52  ;;  %v3006_v4 = vld [vmem:[#allocation4 + $0x228] sm:$0xf] }
  0xa4   :  { %1911 = vmatpush.bf16.msra.mxu2 %v2831_v56  ;;  %1936 = vmatpush.bf16.msra.mxu0 %v3103_v57  ;;  %v3167_v56 = vor.u32 %v4055_v49, %v3166_v47  ;;  %v2878_v57 = vld [vmem:[#allocation4 + $0x128] sm:$0xf]  ;;  %v3983_v58 = vld [vmem:[#allocation4 + $0x134] sm:$0xf0]  ;;  %v3023_v63 = vor.u32 %v4019_v16, %v3022_v55 }
  0xa5   :  { %v4051_v60 = vld [vmem:[#allocation4 + $0x354] sm:$0xf0]  ;;  %v2879_v3 = vor.u32 %v3983_v58, %v2878_v57  ;;  %v3486_v10 = vld [vmem:[#allocation4 + $0x5e8] sm:$0xf] }
  0xa6   :  { %1924 = vmatpush.bf16.msra.mxu3 %v2959_v59  ;;  %1892 = vmatmul.bf16.vlgmr.msrb.gmra.mxu1 %v4573_v36  ;;  %v3150_v59 = vld [vmem:[#allocation4 + $0x348] sm:$0xf]  ;;  %v3979_v2 = vld [vmem:[#allocation4 + $0x114] sm:$0xf0] }
  0xa7   :  { %1949 = vmatpush.bf16.msra.mxu1 %v3231_v0  ;;  %v3947_v0 = vld [vmem:[#allocation4 + $0x14] sm:$0xf0]  ;;  %v3151_v7 = vor.u32 %v4051_v60, %v3150_v59  ;;  %v2990_v19 = vld [vmem:[#allocation4 + $0x208] sm:$0xf] }
  0xa8   :  { %1912 = vmatpush.bf16.msra.mxu2 %v2815_v5  ;;  %1937 = vmatpush.bf16.msra.mxu0 %v3087_v6  ;;  %v4015_v5 = vld [vmem:[#allocation4 + $0x234] sm:$0xf0]  ;;  %v4597_v6 = vld [vmem:[#allocation4 + $0x7c8] sm:$0xff]  ;;  %v2735_v17 = vor.u32 %v3947_v0, %v2734_v61 }
  0xa9   :  { %v4103_v9 = vld [vmem:[#allocation4 + $0x4f4] sm:$0xf0]  ;;  %v3007_v18 = vor.u32 %v4015_v5, %v3006_v4  ;;  %v3342_v26 = vld [vmem:[#allocation4 + $0x4c8] sm:$0xf] }
  0xaa   :  { %1925 = vmatpush.bf16.msra.mxu3 %v2943_v8  ;;  %v3358_v8 = vld [vmem:[#allocation4 + $0x4e8] sm:$0xf]  ;;  %v4135_v11 = vld [vmem:[#allocation4 + $0x5f4] sm:$0xf0] }
  0xab   :  { %1950 = vmatpush.bf16.msra.mxu1 %v3215_v12  ;;  %v3134_v12 = vld [vmem:[#allocation4 + $0x328] sm:$0xf]  ;;  %v4047_v13 = vld [vmem:[#allocation4 + $0x334] sm:$0xf0]  ;;  %v3359_v24 = vor.u32 %v4103_v9, %v3358_v8  ;;  %v3487_v28 = vor.u32 %v4135_v11, %v3486_v10 }
  0xac   :  { %1913 = vmatpush.bf16.msra.mxu2 %v2799_v20  ;;  %1938 = vmatpush.bf16.msra.mxu0 %v3071_v23  ;;  %v1183_v20 = vunpack.c.l.b16 %v4597_v6  ;;  %v2863_v23 = vor.u32 %v3979_v2, %v2862_v1  ;;  %v4099_v27 = vld [vmem:[#allocation4 + $0x4d4] sm:$0xf0]  ;;  %v3470_v30 = vld [vmem:[#allocation4 + $0x5c8] sm:$0xf] }
  0xad   :  { %v3614_v31 = vld [vmem:[#allocation4 + $0x6e8] sm:$0xf]  ;;  %v4167_v32 = vld [vmem:[#allocation4 + $0x6f4] sm:$0xf0]  ;;  %v3343_v39 = vor.u32 %v4099_v27, %v3342_v26 }
  0xae   :  { %1926 = vmatpush.bf16.msra.mxu3 %v2927_v25  ;;  %v4011_v25 = vld [vmem:[#allocation4 + $0x214] sm:$0xf0]  ;;  %v3615_v42 = vor.u32 %v4167_v32, %v3614_v31  ;;  %v3326_v43 = vld [vmem:[#allocation4 + $0x4a8] sm:$0xf] }
  0xaf   :  { %1951 = vmatpush.bf16.msra.mxu1 %v3199_v29  ;;  %v3135_v29 = vor.u32 %v4047_v13, %v3134_v12  ;;  %v4131_v33 = vld [vmem:[#allocation4 + $0x5d4] sm:$0xf0]  ;;  %v2991_v37 = vor.u32 %v4011_v25, %v2990_v19  ;;  %v3598_v47 = vld [vmem:[#allocation4 + $0x6c8] sm:$0xf] }
  0xb0   :  { %1914 = vmatpush.bf16.msra.mxu2 %v2783_v34  ;;  %1939 = vmatpush.bf16.msra.mxu0 %v3055_v35  ;;  %v3118_v34 = vld [vmem:[#allocation4 + $0x308] sm:$0xf]  ;;  %v4043_v35 = vld [vmem:[#allocation4 + $0x314] sm:$0xf0] }
  0xb1   :  { %v3119_v45 = vor.u32 %v4043_v35, %v3118_v34  ;;  %v4095_v46 = vld [vmem:[#allocation4 + $0x4b4] sm:$0xf0]  ;;  %v3582_v59 = vld [vmem:[#allocation4 + $0x6a8] sm:$0xf] }
  0xb2   :  { %1927 = vmatpush.bf16.msra.mxu3 %v2911_v38  ;;  %v1435_v38 = vpack.c.b16 %v1183_v20, %v1183_v20  ;;  %v4163_v49 = vld [vmem:[#allocation4 + $0x6d4] sm:$0xf0]  ;;  %v3327_v55 = vor.u32 %v4095_v46, %v3326_v43  ;;  %v3694_v0 = vld [vmem:[#allocation4 + $0x788] sm:$0xf] }
  0xb3   :  { %1952 = vmatpush.bf16.msra.mxu1 %v3183_v44  ;;  %v3471_v44 = vor.u32 %v4131_v33, %v3470_v30  ;;  %v4191_v54 = vld [vmem:[#allocation4 + $0x7b4] sm:$0xf0]  ;;  %v3599_v16 = vor.u32 %v4163_v49, %v3598_v47  ;;  %v3294_v4 = vld [vmem:[#allocation4 + $0x468] sm:$0xf] }
  0xb4   :  { %1915 = vmatpush.bf16.msra.mxu2 %v2767_v50  ;;  %1940 = vmatpush.bf16.msra.mxu0 %v3039_v51  ;;  %v3454_v50 = vld [vmem:[#allocation4 + $0x5a8] sm:$0xf]  ;;  %v4127_v51 = vld [vmem:[#allocation4 + $0x5b4] sm:$0xf0]  ;;  %v1697_v52 = vsel %vm1689_vm0, %v1435_v38, 0 }
  0xb5   :  { %v3455_v57 = vor.u32 %v4127_v51, %v3454_v50  ;;  %v4091_v58 = vld [vmem:[#allocation4 + $0x494] sm:$0xf0]  ;;  %v3566_v8 = vld [vmem:[#allocation4 + $0x688] sm:$0xf] }
  0xb6   :  { %1928 = vmatpush.bf16.msra.mxu3 %v2895_v53  ;;  %v3710_v53 = vld [vmem:[#allocation4 + $0x7a8] sm:$0xf]  ;;  %v4159_v60 = vld [vmem:[#allocation4 + $0x6b4] sm:$0xf0] }
  0xb7   :  { %1953 = vmatpush.bf16.msra.mxu1 %v3167_v56  ;;  %v3310_v56 = vld [vmem:[#allocation4 + $0x488] sm:$0xf]  ;;  %v3711_v61 = vor.u32 %v4191_v54, %v3710_v53  ;;  %v4187_v1 = vld [vmem:[#allocation4 + $0x794] sm:$0xf0] }
  0xb8   :  { %1916 = vmatpush.bf16.msra.mxu2 %v2751_v62  ;;  %1941 = vmatpush.bf16.msra.mxu0 %v3023_v63  ;;  %v3438_v62 = vld [vmem:[#allocation4 + $0x588] sm:$0xf]  ;;  %v4123_v63 = vld [vmem:[#allocation4 + $0x594] sm:$0xf0]  ;;  %v3311_v2 = vor.u32 %v4091_v58, %v3310_v56  ;;  %v3695_v10 = vor.u32 %v4187_v1, %v3694_v0  ;;  %v2976_v58 = vld [vmem:[#allocation4 + $0x1f8] sm:$0xf0] }
  0xb9   :  { %v3439_v5 = vor.u32 %v4123_v63, %v3438_v62  ;;  %v4155_v9 = vld [vmem:[#allocation4 + $0x694] sm:$0xf0]  ;;  %v3422_v11 = vld [vmem:[#allocation4 + $0x568] sm:$0xf] }
  0xba   :  { %1929 = vmatpush.bf16.msra.mxu3 %v2879_v3  ;;  %v3583_v3 = vor.u32 %v4159_v60, %v3582_v59  ;;  %v4119_v12 = vld [vmem:[#allocation4 + $0x574] sm:$0xf0]  ;;  %v3678_v13 = vld [vmem:[#allocation4 + $0x768] sm:$0xf]  ;;  %v3567_v19 = vor.u32 %v4155_v9, %v3566_v8  ;;  %v4037_v59 = vld [vmem:[#allocation4 + $0x2ec] sm:$0xf] }
  0xbb   :  { %1954 = vmatpush.bf16.msra.mxu1 %v3151_v7  ;;  %v4087_v7 = vld [vmem:[#allocation4 + $0x474] sm:$0xf0]  ;;  %v3278_v20 = vld [vmem:[#allocation4 + $0x448] sm:$0xf]  ;;  %v3104_v60 = vld [vmem:[#allocation4 + $0x2f8] sm:$0xf0] }
  0xbc   :  { %1917 = vmatpush.bf16.msra.mxu2 %v2735_v17  ;;  %1942 = vmatpush.bf16.msra.mxu0 %v3007_v18  ;;  %v4183_v17 = vld [vmem:[#allocation4 + $0x774] sm:$0xf0]  ;;  %v3295_v18 = vor.u32 %v4087_v7, %v3294_v4  ;;  %v3550_v25 = vld [vmem:[#allocation4 + $0x668] sm:$0xf]  ;;  %v3973_v4 = vld [vmem:[#allocation4 + $0xec] sm:$0xf] }
  0xbd   :  { %v4151_v26 = vld [vmem:[#allocation4 + $0x674] sm:$0xf0]  ;;  %v3679_v27 = vor.u32 %v4183_v17, %v3678_v13  ;;  %v3662_v30 = vld [vmem:[#allocation4 + $0x748] sm:$0xf]  ;;  %v2960_v17 = vld [vmem:[#allocation4 + $0x1d8] sm:$0xf0] }
  0xbe   :  { %1930 = vmatpush.bf16.msra.mxu3 %v2863_v23  ;;  %v3423_v23 = vor.u32 %v4119_v12, %v3422_v11  ;;  %v4179_v31 = vld [vmem:[#allocation4 + $0x754] sm:$0xf0]  ;;  %v3551_v33 = vor.u32 %v4151_v26, %v3550_v25  ;;  %v3262_v34 = vld [vmem:[#allocation4 + $0x428] sm:$0xf]  ;;  %v4001_v11 = vld [vmem:[#allocation4 + $0x1cc] sm:$0xf]  ;;  %v3107_v12 = vor.u32 %v4037_v59, %v3104_v60 }
  0xbf   :  { %1955 = vmatpush.bf16.msra.mxu1 %v3135_v29  ;;  %1918 = vmatmul.bf16.vlgmr.msra.gmra.mxu2 %v4563_v15  ;;  %v4115_v29 = vld [vmem:[#allocation4 + $0x554] sm:$0xf0]  ;;  %v3534_v38 = vld [vmem:[#allocation4 + $0x648] sm:$0xf]  ;;  %v3961_v60 = vld [vmem:[#allocation4 + $0x8c] sm:$0xf] }
  0xc0   :  { %1962 = vmatpush.bf16.msrb.mxu2 %v3359_v24  ;;  %1943 = vmatpush.bf16.msra.mxu0 %v2991_v37  ;;  %v4083_v24 = vld [vmem:[#allocation4 + $0x454] sm:$0xf0]  ;;  %v3390_v43 = vld [vmem:[#allocation4 + $0x528] sm:$0xf] }
  0xc1   :  { %1931 = vmatmul.bf16.vlgmr.msra.gmra.mxu3 %v4567_v22  ;;  %v3279_v32 = vor.u32 %v4083_v24, %v3278_v20  ;;  %v4079_v37 = vld [vmem:[#allocation4 + $0x434] sm:$0xf0]  ;;  %v3246_v50 = vld [vmem:[#allocation4 + $0x408] sm:$0xf]  ;;  %v3088_v24 = vld [vmem:[#allocation4 + $0x2d8] sm:$0xf0] }
  0xc2   :  { %1975 = vmatpush.bf16.msrb.mxu3 %v3487_v28  ;;  %v3406_v28 = vld [vmem:[#allocation4 + $0x548] sm:$0xf]  ;;  %v4175_v46 = vld [vmem:[#allocation4 + $0x734] sm:$0xf0]  ;;  %v3263_v47 = vor.u32 %v4079_v37, %v3262_v34  ;;  %v4065_v37 = vld [vmem:[#allocation4 + $0x3cc] sm:$0xf] }
  0xc3   :  { %1956 = vmatpush.bf16.msra.mxu1 %v3119_v45  ;;  %1944 = vmatmul.bf16.vlgmr.msra.gmra.mxu0 %v4561_v14  ;;  %v3407_v35 = vor.u32 %v4115_v29, %v3406_v28  ;;  %v3646_v45 = vld [vmem:[#allocation4 + $0x728] sm:$0xf]  ;;  %v4075_v51 = vld [vmem:[#allocation4 + $0x414] sm:$0xf0]  ;;  %v2832_v28 = vld [vmem:[#allocation4 + $0xd8] sm:$0xf0] }
  0xc4   :  { %1963 = vmatpush.bf16.msrb.mxu2 %v3343_v39  ;;  %1988 = vmatpush.bf16.msrb.mxu0 %v3615_v42  ;;  %v4147_v39 = vld [vmem:[#allocation4 + $0x654] sm:$0xf0]  ;;  %v3663_v42 = vor.u32 %v4179_v31, %v3662_v30  ;;  %v3647_v56 = vor.u32 %v4175_v46, %v3646_v45  ;;  %v3630_v62 = vld [vmem:[#allocation4 + $0x708] sm:$0xf]  ;;  %v3247_v0 = vor.u32 %v4075_v51, %v3246_v50  ;;  %v3965_v46 = vld [vmem:[#allocation4 + $0xac] sm:$0xf] }
  0xc5   :  { %v3535_v49 = vor.u32 %v4147_v39, %v3534_v38  ;;  %v4107_v54 = vld [vmem:[#allocation4 + $0x514] sm:$0xf0]  ;;  %v3502_v9 = vld [vmem:[#allocation4 + $0x608] sm:$0xf]  ;;  %v2963_v30 = vor.u32 %v4001_v11, %v2960_v17  ;;  %v3216_v38 = vld [vmem:[#allocation4 + $0x3d8] sm:$0xf0] }
  0xc6   :  { %1976 = vmatpush.bf16.msrb.mxu3 %v3471_v44  ;;  %1957 = vmatmul.bf16.vlgmr.msra.gmra.mxu1 %v4565_v21  ;;  %v4111_v44 = vld [vmem:[#allocation4 + $0x534] sm:$0xf0]  ;;  %v3219_v50 = vor.u32 %v4065_v37, %v3216_v38  ;;  %v3993_v51 = vld [vmem:[#allocation4 + $0x18c] sm:$0xf]  ;;  %v2784_v17 = vld [vmem:[#allocation4 + $0x78] sm:$0xf0] }
  0xc7   :  { %2002 = vmatpush.bf16.msrb.mxu1 %v1697_v52  ;;  %v3374_v52 = vld [vmem:[#allocation4 + $0x508] sm:$0xf]  ;;  %v3391_v53 = vor.u32 %v4111_v44, %v3390_v43  ;;  %v4171_v63 = vld [vmem:[#allocation4 + $0x714] sm:$0xf0]  ;;  %v3072_v43 = vld [vmem:[#allocation4 + $0x2b8] sm:$0xf0] }
  0xc8   :  { %1964 = vmatpush.bf16.msrb.mxu2 %v3327_v55  ;;  %1989 = vmatpush.bf16.msrb.mxu0 %v3599_v16  ;;  %v3518_v55 = vld [vmem:[#allocation4 + $0x628] sm:$0xf]  ;;  %v4143_v16 = vld [vmem:[#allocation4 + $0x634] sm:$0xf0]  ;;  %v3375_v7 = vor.u32 %v4107_v54, %v3374_v52  ;;  %v3631_v13 = vor.u32 %v4171_v63, %v3630_v62  ;;  %v2928_v54 = vld [vmem:[#allocation4 + $0x198] sm:$0xf0] }
  0xc9   :  { %v3519_v1 = vor.u32 %v4143_v16, %v3518_v55  ;;  %v4061_v55 = vld [vmem:[#allocation4 + $0x3ac] sm:$0xf]  ;;  %v3200_v16 = vld [vmem:[#allocation4 + $0x3b8] sm:$0xf0] }
  0xca   :  { %1977 = vmatpush.bf16.msrb.mxu3 %v3455_v57  ;;  %v4005_v57 = vld [vmem:[#allocation4 + $0x1ec] sm:$0xf]  ;;  %v2800_v62 = vld [vmem:[#allocation4 + $0x98] sm:$0xf0]  ;;  %v3203_v63 = vor.u32 %v4061_v55, %v3200_v16 }
  0xcb   :  { %2003 = vmatpush.bf16.msrb.mxu1 %v3711_v61  ;;  %v2979_v8 = vor.u32 %v4005_v57, %v2976_v58  ;;  %v4025_v57 = vld [vmem:[#allocation4 + $0x28c] sm:$0xf]  ;;  %v3056_v58 = vld [vmem:[#allocation4 + $0x298] sm:$0xf0] }
  0xcc   :  { %1965 = vmatpush.bf16.msrb.mxu2 %v3311_v2  ;;  %1990 = vmatpush.bf16.msrb.mxu0 %v3583_v3  ;;  %v4605_v2 = vld [vmem:[#allocation6] sm:$0xf]  ;;  %v4021_v11 = vld [vmem:[#allocation4 + $0x26c] sm:$0xf]  ;;  %v2864_v55 = vld [vmem:[#allocation4 + $0x118] sm:$0xf0] }
  0xcd   :  { %v1711_v61 = vpop.f32.mrf.mxu0  ;;  %v427_v29 = vperm.slane %v4605_v2, 0  ;;  %v3981_v38 = vld [vmem:[#allocation4 + $0x12c] sm:$0xf] }
  0xce   :  { %1978 = vmatpush.bf16.msrb.mxu3 %v3439_v5  ;;  %v4607_v3 = vpop.f32.mrf.mxu1  ;;  %v2848_v5 = vld [vmem:[#allocation4 + $0xf8] sm:$0xf0]  ;;  %v4009_v16 = vld [vmem:[#allocation4 + $0x20c] sm:$0xf] }
  0xcf   :  { %2004 = vmatpush.bf16.msrb.mxu1 %v3695_v10  ;;  %v4139_v10 = vld [vmem:[#allocation4 + $0x614] sm:$0xf0]  ;;  %v2851_v20 = vor.u32 %v3973_v4, %v2848_v5  ;;  %v1712_v52 = vadd.f32 %v1711_v61, %v427_v29  ;;  %v2931_v61 = vor.u32 %v3993_v51, %v2928_v54  ;;  %v3059_v4 = vor.u32 %v4025_v57, %v3056_v58  ;;  %v4017_v29 = vld [vmem:[#allocation4 + $0x24c] sm:$0xf]  ;;  %v2752_v51 = vld [vmem:[#allocation4 + $0x38] sm:$0xf0] }
  0xd0   :  { %1966 = vmatpush.bf16.msrb.mxu2 %v3295_v18  ;;  %1991 = vmatpush.bf16.msrb.mxu0 %v3567_v19  ;;  %v4069_v18 = vld [vmem:[#allocation4 + $0x3ec] sm:$0xf]  ;;  %v3232_v19 = vld [vmem:[#allocation4 + $0x3f8] sm:$0xf0]  ;;  %v3503_v25 = vor.u32 %v4139_v10, %v3502_v9  ;;  %v2803_v10 = vor.u32 %v3961_v60, %v2800_v62 }
  0xd1   :  { %v3235_v31 = vor.u32 %v4069_v18, %v3232_v19  ;;  %v3184_v9 = vld [vmem:[#allocation4 + $0x398] sm:$0xf0]  ;;  %v3977_v54 = vld [vmem:[#allocation4 + $0x10c] sm:$0xf] }
  0xd2   :  { %1979 = vmatpush.bf16.msrb.mxu3 %v3423_v23  ;;  %v4033_v23 = vld [vmem:[#allocation4 + $0x2cc] sm:$0xf]  ;;  %v2992_v58 = vld [vmem:[#allocation4 + $0x218] sm:$0xf0] }
  0xd3   :  { %2005 = vmatpush.bf16.msrb.mxu1 %v3679_v27  ;;  %v4609_v26 = vpop.f32.mrf.mxu2  ;;  %v3969_v27 = vld [vmem:[#allocation4 + $0xcc] sm:$0xf]  ;;  %v3136_v60 = vld [vmem:[#allocation4 + $0x338] sm:$0xf0] }
  0xd4   :  { %1967 = vmatpush.bf16.msrb.mxu2 %v3279_v32  ;;  %1992 = vmatpush.bf16.msrb.mxu0 %v3551_v33  ;;  %v3997_v32 = vld [vmem:[#allocation4 + $0x1ac] sm:$0xf]  ;;  %v3091_v33 = vor.u32 %v4033_v23, %v3088_v24  ;;  %v4612_v34 = vpop.f32.mrf.mxu3  ;;  %v2835_v39 = vor.u32 %v3969_v27, %v2832_v28  ;;  %v2896_v24 = vld [vmem:[#allocation4 + $0x158] sm:$0xf0] }
  0xd5   :  { %v1713_v44 = vpop.f32.mrf.mxu0  ;;  %v3168_v27 = vld [vmem:[#allocation4 + $0x378] sm:$0xf0] }
  0xd6   :  { %1980 = vmatpush.bf16.msrb.mxu3 %v3407_v35  ;;  %v2944_v35 = vld [vmem:[#allocation4 + $0x1b8] sm:$0xf0]  ;;  %v1726_v45 = vpop.f32.mrf.mxu1 }
  0xd7   :  { %2006 = vmatpush.bf16.msrb.mxu1 %v3663_v42  ;;  %v4029_v42 = vld [vmem:[#allocation4 + $0x2ac] sm:$0xf]  ;;  %v3152_v44 = vld [vmem:[#allocation4 + $0x358] sm:$0xf0] }
  0xd8   :  { %1968 = vmatpush.bf16.msrb.mxu2 %v3263_v47  ;;  %1993 = vmatpush.bf16.msrb.mxu0 %v3535_v49  ;;  %v2816_v47 = vld [vmem:[#allocation4 + $0xb8] sm:$0xf0]  ;;  %v2947_v49 = vor.u32 %v3997_v32, %v2944_v35 }
  0xd9   :  { %v2768_v32 = vld [vmem:[#allocation4 + $0x58] sm:$0xf0] }
  0xda   :  { %1981 = vmatpush.bf16.msrb.mxu3 %v3391_v53  ;;  %v3075_v53 = vor.u32 %v4029_v42, %v3072_v43  ;;  %v2880_v42 = vld [vmem:[#allocation4 + $0x138] sm:$0xf0]  ;;  %v4049_v43 = vld [vmem:[#allocation4 + $0x34c] sm:$0xf] }
  0xdb   :  { %2007 = vmatpush.bf16.msrb.mxu1 %v3647_v56  ;;  %v2819_v56 = vor.u32 %v3965_v46, %v2816_v47  ;;  %v1739_v59 = vpop.f32.mrf.mxu2  ;;  %v4013_v47 = vld [vmem:[#allocation4 + $0x22c] sm:$0xf] }
  0xdc   :  { %1969 = vmatpush.bf16.msrb.mxu2 %v3247_v0  ;;  %1994 = vmatpush.bf16.msrb.mxu0 %v3519_v1  ;;  %v3989_v0 = vld [vmem:[#allocation4 + $0x16c] sm:$0xf]  ;;  %v1725_v1 = vadd.f32 %v4607_v3, %v1712_v52  ;;  %v1752_v5 = vpop.f32.mrf.mxu3  ;;  %v2883_v52 = vor.u32 %v3981_v38, %v2880_v42 }
  0xdd   :  { %v4045_v59 = vld [vmem:[#allocation4 + $0x32c] sm:$0xf] }
  0xde   :  { %1982 = vmatpush.bf16.msrb.mxu3 %v3375_v7  ;;  %v2912_v7 = vld [vmem:[#allocation4 + $0x178] sm:$0xf0]  ;;  %v1738_v23 = vadd.f32 %v4609_v26, %v1725_v1  ;;  %v4165_v1 = vld [vmem:[#allocation4 + $0x6ec] sm:$0xf] }
  0xdf   :  { %2008 = vmatpush.bf16.msrb.mxu1 %v3631_v13  ;;  %1970 = vmatmul.bf16.vlgmr.msrb.gmra.mxu2 %v4575_v40  ;;  %v3957_v13 = vld [vmem:[#allocation4 + $0x6c] sm:$0xf]  ;;  %v2915_v18 = vor.u32 %v3989_v0, %v2912_v7  ;;  %v3488_v0 = vld [vmem:[#allocation4 + $0x5f8] sm:$0xf0] }
  0xe0   :  { %2027 = vmatpush.bf16.msra.mxu2 %v2979_v8  ;;  %1995 = vmatpush.bf16.msrb.mxu0 %v3503_v25  ;;  %v4057_v8 = vld [vmem:[#allocation4 + $0x38c] sm:$0xf]  ;;  %v2787_v28 = vor.u32 %v3957_v13, %v2784_v17  ;;  %v2736_v7 = vld [vmem:[#allocation4 + $0x18] sm:$0xf0]  ;;  %v2995_v17 = vor.u32 %v4009_v16, %v2992_v58 }
  0xe1   :  { %1983 = vmatmul.bf16.vlgmr.msrb.gmra.mxu3 %v4579_v48  ;;  %v3187_v19 = vor.u32 %v4057_v8, %v3184_v9  ;;  %v4053_v25 = vld [vmem:[#allocation4 + $0x36c] sm:$0xf]  ;;  %v2867_v8 = vor.u32 %v3977_v54, %v2864_v55  ;;  %v3139_v9 = vor.u32 %v4045_v59, %v3136_v60  ;;  %v3440_v16 = vld [vmem:[#allocation4 + $0x598] sm:$0xf0] }
  0xe2   :  { %2040 = vmatpush.bf16.msra.mxu3 %v3107_v12  ;;  %3718 = vmatmul.msk.bf16.vlgmr.msrb.gmra.mxu1 %vm1685_vm1, %v4577_v41  ;;  %v3040_v12 = vld [vmem:[#allocation4 + $0x278] sm:$0xf0]  ;;  %v3171_v37 = vor.u32 %v4053_v25, %v3168_v27  ;;  %v3945_v5 = vld [vmem:[#allocation4 + $0xc] sm:$0xf] }
  0xe3   :  { %2014 = vmatpush.bf16.msra.mxu1 %v2851_v20  ;;  %1996 = vmatmul.bf16.vlgmr.msrb.gmra.mxu0 %v4573_v36  ;;  %v3985_v20 = vld [vmem:[#allocation4 + $0x14c] sm:$0xf]  ;;  %v3043_v3 = vor.u32 %v4021_v11, %v3040_v12  ;;  %v1776_v45 = vpop.f32.mrf.mxu1  ;;  %v3360_v11 = vld [vmem:[#allocation4 + $0x4f8] sm:$0xf0] }
  0xe4   :  { %2028 = vmatpush.bf16.msra.mxu2 %v2963_v30  ;;  %2053 = vmatpush.bf16.msra.mxu0 %v3235_v31  ;;  %v3024_v30 = vld [vmem:[#allocation4 + $0x258] sm:$0xf0]  ;;  %v3953_v31 = vld [vmem:[#allocation4 + $0x4c] sm:$0xf]  ;;  %v2899_v35 = vor.u32 %v3985_v20, %v2896_v24 }
  0xe5   :  { %v3027_v26 = vor.u32 %v4017_v29, %v3024_v30  ;;  %v2771_v46 = vor.u32 %v3953_v31, %v2768_v32  ;;  %v3120_v20 = vld [vmem:[#allocation4 + $0x318] sm:$0xf0]  ;;  %v4129_v24 = vld [vmem:[#allocation4 + $0x5cc] sm:$0xf] }
  0xe6   :  { %2041 = vmatpush.bf16.msra.mxu3 %v3091_v33  ;;  %v1763_v33 = vpop.f32.mrf.mxu0  ;;  %v3472_v25 = vld [vmem:[#allocation4 + $0x5d8] sm:$0xf0]  ;;  %v4161_v29 = vld [vmem:[#allocation4 + $0x6cc] sm:$0xf] }
  0xe7   :  { %2015 = vmatpush.bf16.msra.mxu1 %v2835_v39  ;;  %v1751_v39 = vadd.f32 %v4612_v34, %v1738_v23  ;;  %v1802_v62 = vpop.f32.mrf.mxu3  ;;  %v3600_v30 = vld [vmem:[#allocation4 + $0x6d8] sm:$0xf0]  ;;  %v4097_v32 = vld [vmem:[#allocation4 + $0x4cc] sm:$0xf] }
  0xe8   :  { %2029 = vmatpush.bf16.msra.mxu2 %v2947_v49  ;;  %2054 = vmatpush.bf16.msra.mxu0 %v3219_v50  ;;  %v3008_v49 = vld [vmem:[#allocation4 + $0x238] sm:$0xf0]  ;;  %v3949_v50 = vld [vmem:[#allocation4 + $0x2c] sm:$0xf] }
  0xe9   :  { %v1764_v34 = vadd.f32 %v1763_v33, %v1751_v39  ;;  %v3011_v57 = vor.u32 %v4013_v47, %v3008_v49  ;;  %v3344_v33 = vld [vmem:[#allocation4 + $0x4d8] sm:$0xf0]  ;;  %v4199_v38 = vld [vmem:[#allocation7 + $0x38] sm:$0xff] }
  0xea   :  { %2042 = vmatpush.bf16.msra.mxu3 %v3075_v53  ;;  %v3155_v53 = vor.u32 %v4049_v43, %v3152_v44  ;;  %v4125_v42 = vld [vmem:[#allocation4 + $0x5ac] sm:$0xf]  ;;  %v3456_v43 = vld [vmem:[#allocation4 + $0x5b8] sm:$0xf0] }
  0xeb   :  { %2016 = vmatpush.bf16.msra.mxu1 %v2819_v56  ;;  %v1789_v56 = vpop.f32.mrf.mxu2  ;;  %v1777_v13 = vadd.f32 %v1776_v45, %v1764_v34  ;;  %v1778_v27 = vpop.f32.mrf.mxu1  ;;  %v3347_v45 = vor.u32 %v4097_v32, %v3344_v33  ;;  %v3584_v47 = vld [vmem:[#allocation4 + $0x6b8] sm:$0xf0]  ;;  %v4093_v49 = vld [vmem:[#allocation4 + $0x4ac] sm:$0xf] }
  0xec   :  { %2030 = vmatpush.bf16.msra.mxu2 %v2931_v61  ;;  %2055 = vmatpush.bf16.msra.mxu0 %v3203_v63  ;;  %v2755_v61 = vor.u32 %v3949_v50, %v2752_v51  ;;  %v4133_v63 = vld [vmem:[#allocation4 + $0x5ec] sm:$0xf]  ;;  %v3328_v50 = vld [vmem:[#allocation4 + $0x4b8] sm:$0xf0] }
  0xed   :  { %v4121_v55 = vld [vmem:[#allocation4 + $0x58c] sm:$0xf]  ;;  %v3331_v34 = vor.u32 %v4093_v49, %v3328_v50  ;;  %v4197_v60 = vld [vmem:[#allocation7 + $0x28] sm:$0xff] }
  0xee   :  { %2043 = vmatpush.bf16.msra.mxu3 %v3059_v4  ;;  %v3616_v4 = vld [vmem:[#allocation4 + $0x6f8] sm:$0xf0]  ;;  %v1765_v12 = vpop.f32.mrf.mxu0  ;;  %v3443_v59 = vor.u32 %v4121_v55, %v3440_v16  ;;  %v4077_v32 = vld [vmem:[#allocation4 + $0x42c] sm:$0xf] }
  0xef   :  { %2017 = vmatpush.bf16.msra.mxu1 %v2803_v10  ;;  %v4101_v10 = vld [vmem:[#allocation4 + $0x4ec] sm:$0xf]  ;;  %v3619_v23 = vor.u32 %v4165_v1, %v3616_v4  ;;  %v1804_v44 = vpop.f32.mrf.mxu3  ;;  %v3552_v1 = vld [vmem:[#allocation4 + $0x678] sm:$0xf0] }
  0xf0   :  { %2031 = vmatpush.bf16.msra.mxu2 %v2915_v18  ;;  %2056 = vmatpush.bf16.msra.mxu0 %v3187_v19  ;;  %v3491_v18 = vor.u32 %v4133_v63, %v3488_v0  ;;  %v4041_v19 = vld [vmem:[#allocation4 + $0x30c] sm:$0xf]  ;;  %v3424_v63 = vld [vmem:[#allocation4 + $0x578] sm:$0xf0] }
  0xf1   :  { %v3123_v31 = vor.u32 %v4041_v19, %v3120_v20  ;;  %v4149_v0 = vld [vmem:[#allocation4 + $0x66c] sm:$0xf]  ;;  %v3264_v33 = vld [vmem:[#allocation4 + $0x438] sm:$0xf0] }
  0xf2   :  { %2044 = vmatpush.bf16.msra.mxu3 %v3043_v3  ;;  %v2739_v3 = vor.u32 %v3945_v5, %v2736_v7  ;;  %v4085_v4 = vld [vmem:[#allocation4 + $0x46c] sm:$0xf]  ;;  %v3296_v5 = vld [vmem:[#allocation4 + $0x478] sm:$0xf0]  ;;  %v4196_v7 = vld [vmem:[#allocation7 + $0x20] sm:$0xff] }
  0xf3   :  { %2018 = vmatpush.bf16.msra.mxu1 %v2787_v28  ;;  %v3363_v28 = vor.u32 %v4101_v10, %v3360_v11  ;;  %v1791_v39 = vpop.f32.mrf.mxu2  ;;  %v3408_v10 = vld [vmem:[#allocation4 + $0x558] sm:$0xf0]  ;;  %v3299_v11 = vor.u32 %v4085_v4, %v3296_v5  ;;  %v4145_v12 = vld [vmem:[#allocation4 + $0x64c] sm:$0xf]  ;;  %v4206_v5 = vld [vmem:[#allocation7 + $0x70] sm:$0xff] }
  0xf4   :  { %2032 = vmatpush.bf16.msra.mxu2 %v2899_v35  ;;  %2057 = vmatpush.bf16.msra.mxu0 %v3171_v37  ;;  %v1790_v35 = vadd.f32 %v1789_v56, %v1777_v13  ;;  %v3475_v37 = vor.u32 %v4129_v24, %v3472_v25  ;;  %v3568_v56 = vld [vmem:[#allocation4 + $0x698] sm:$0xf0]  ;;  %v4195_v20 = vld [vmem:[#allocation7 + $0x18] sm:$0xff] }
  0xf5   :  { %v3536_v13 = vld [vmem:[#allocation4 + $0x658] sm:$0xf0]  ;;  %v4109_v24 = vld [vmem:[#allocation4 + $0x52c] sm:$0xf] }
  0xf6   :  { %2045 = vmatpush.bf16.msra.mxu3 %v3027_v26  ;;  %v3603_v26 = vor.u32 %v4161_v29, %v3600_v30  ;;  %v4624_v51 = vadd.f32 %v1802_v62, %v1790_v35  ;;  %v3392_v25 = vld [vmem:[#allocation4 + $0x538] sm:$0xf0]  ;;  %v4141_v29 = vld [vmem:[#allocation4 + $0x62c] sm:$0xf]  ;;  %v1184_v35 = vunpack.c.h.b16 %v4597_v6 }
  0xf7   :  { %2019 = vmatpush.bf16.msra.mxu1 %v2771_v46  ;;  %v4157_v46 = vld [vmem:[#allocation4 + $0x6ac] sm:$0xf]  ;;  %v3520_v30 = vld [vmem:[#allocation4 + $0x638] sm:$0xf0] }
  0xf8   :  { %2033 = vmatpush.bf16.msra.mxu2 %v2883_v52  ;;  %2058 = vmatpush.bf16.msra.mxu0 %v3155_v53  ;;  %v3459_v52 = vor.u32 %v4125_v42, %v3456_v43  ;;  %v4198_v53 = vld [vmem:[#allocation7 + $0x30] sm:$0xff]  ;;  %v3587_v54 = vor.u32 %v4157_v46, %v3584_v47  ;;  %v2118_v58 = vmul.f32 0.5, %v4624_v51  ;;  %v4105_v42 = vld [vmem:[#allocation4 + $0x50c] sm:$0xf]  ;;  %v3376_v43 = vld [vmem:[#allocation4 + $0x518] sm:$0xf0]  ;;  %v1436_v50 = vpack.c.b16 %v1184_v35, %v1184_v35 }
  0xf9   :  { %v4137_v46 = vld [vmem:[#allocation4 + $0x60c] sm:$0xf]  ;;  %v3504_v47 = vld [vmem:[#allocation4 + $0x618] sm:$0xf0]  ;;  %v3379_v6 = vor.u32 %v4105_v42, %v3376_v43 }
  0xfa   :  { %2046 = vmatpush.bf16.msra.mxu3 %v3011_v57  ;;  %v4089_v57 = vld [vmem:[#allocation4 + $0x48c] sm:$0xf]  ;;  %4263 = vtanh.f32 %v2118_v58  ;;  %v3712_v58 = vld [vmem:[#allocation4 + $0x7b8] sm:$0xf0] }
  0xfb   :  { %2020 = vmatpush.bf16.msra.mxu1 %v2755_v61  ;;  %v4117_v61 = vld [vmem:[#allocation4 + $0x56c] sm:$0xf]  ;;  %v3696_v4 = vld [vmem:[#allocation4 + $0x798] sm:$0xf0] }
  0xfc   :  { %2034 = vmatpush.bf16.msra.mxu2 %v2867_v8  ;;  %2059 = vmatpush.bf16.msra.mxu0 %v3139_v9  ;;  %v3555_v8 = vor.u32 %v4149_v0, %v3552_v1  ;;  %v4113_v9 = vld [vmem:[#allocation4 + $0x54c] sm:$0xf] }
  0xfd   :  { %v3411_v19 = vor.u32 %v4113_v9, %v3408_v10  ;;  %v4185_v1 = vld [vmem:[#allocation4 + $0x78c] sm:$0xf]  ;;  %v3680_v9 = vld [vmem:[#allocation4 + $0x778] sm:$0xf0] }
  0xfe   :  { %2047 = vmatpush.bf16.msra.mxu3 %v2995_v17  ;;  %v4081_v17 = vld [vmem:[#allocation4 + $0x44c] sm:$0xf]  ;;  %v4205_v10 = vld [vmem:[#allocation7 + $0x68] sm:$0xff] }
  0xff   :  { %2021 = vmatpush.bf16.msra.mxu1 %v2739_v3  ;;  %2035 = vmatmul.bf16.vlgmr.msra.gmra.mxu2 %v4567_v22  ;;  %v4153_v22 = vld [vmem:[#allocation4 + $0x68c] sm:$0xf]  ;;  %v3539_v3 = vor.u32 %v4145_v12, %v3536_v13  ;;  %v3664_v13 = vld [vmem:[#allocation4 + $0x758] sm:$0xf0] }
 0x100   :  { %2079 = vmatpush.bf16.msrb.mxu2 %v3491_v18  ;;  %2060 = vmatpush.bf16.msra.mxu0 %v3123_v31  ;;  %v3571_v62 = vor.u32 %v4153_v22, %v3568_v56  ;;  %v3280_v18 = vld [vmem:[#allocation4 + $0x458] sm:$0xf0]  ;;  %v4264_v27 = vpop.eup %4263  ;;  %v4177_v12 = vld [vmem:[#allocation4 + $0x74c] sm:$0xf] }
 0x101   :  { %2048 = vmatmul.bf16.vlgmr.msra.gmra.mxu3 %v4561_v14  ;;  %v3312_v14 = vld [vmem:[#allocation4 + $0x498] sm:$0xf0]  ;;  %v2126_v39 = vadd.f32 1.0, %v4264_v27 }
 0x102   :  { %2092 = vmatpush.bf16.msrb.mxu3 %v3619_v23  ;;  %2022 = vmatmul.bf16.vlgmr.msra.gmra.mxu1 %v4563_v15  ;;  %v3315_v15 = vor.u32 %v4089_v57, %v3312_v14  ;;  %v4629_v23 = vpop.f32.mrf.mxu0  ;;  %v1700_v57 = vsel %vm1689_vm0, %v1436_v50, 0  ;;  %v4189_v14 = vld [vmem:[#allocation4 + $0x7ac] sm:$0xf] }
 0x103   :  { %2066 = vmatpush.bf16.msrb.mxu1 %v3363_v28  ;;  %2061 = vmatmul.bf16.vlgmr.msra.gmra.mxu0 %v4565_v21  ;;  %v3427_v21 = vor.u32 %v4117_v61, %v3424_v63  ;;  %v3283_v28 = vor.u32 %v4081_v17, %v3280_v18  ;;  %v4631_v31 = vpop.f32.mrf.mxu1  ;;  %v2130_v16 = vmul.f32 0.5, %v2126_v39  ;;  %v4204_v17 = vld [vmem:[#allocation7 + $0x60] sm:$0xff]  ;;  %v3667_v18 = vor.u32 %v4177_v12, %v3664_v13 }
 0x104   :  { %2080 = vmatpush.bf16.msrb.mxu2 %v3475_v37  ;;  %2402 = vmatpush.bf16.msrb.mxu0 %v4199_v38  ;;  %v3395_v37 = vor.u32 %v4109_v24, %v3392_v25  ;;  %v4194_v38 = vld [vmem:[#allocation7 + $0x10] sm:$0xff]  ;;  %v1815_v44 = vpop.f32.mrf.mxu3 }
 0x105   :  { %v2134_v61 = vmul.f32 %v2130_v16, %v4624_v51  ;;  %v3699_v51 = vor.u32 %v4185_v1, %v3696_v4  ;;  %v4213_v16 = vld [vmem:[#allocation7 + $0xa8] sm:$0xff]  ;;  %v4208_v1 = vld [vmem:[#allocation7 + $0x80] sm:$0xff] }
 0x106   :  { %2093 = vmatpush.bf16.msrb.mxu3 %v3603_v26  ;;  %v3523_v26 = vor.u32 %v4141_v29, %v3520_v30  ;;  %v4169_v29 = vld [vmem:[#allocation4 + $0x70c] sm:$0xf]  ;;  %v3632_v30 = vld [vmem:[#allocation4 + $0x718] sm:$0xf0] }
 0x107   :  { %2067 = vmatpush.bf16.msrb.mxu1 %v3347_v45  ;;  %v3267_v45 = vor.u32 %v4077_v32, %v3264_v33  ;;  %v4202_v32 = vld [vmem:[#allocation7 + $0x50] sm:$0xff] }
 0x108   :  { %2081 = vmatpush.bf16.msrb.mxu2 %v3459_v52  ;;  %2403 = vmatpush.bf16.msrb.mxu0 %v4198_v53  ;;  %v1854_v49 = vpop.f32.mrf.mxu2  ;;  %v4073_v52 = vld [vmem:[#allocation4 + $0x40c] sm:$0xf]  ;;  %v3248_v53 = vld [vmem:[#allocation4 + $0x418] sm:$0xf0] }
 0x109   :  { %v3251_v22 = vor.u32 %v4073_v52, %v3248_v53 }
 0x10a   :  { %2094 = vmatpush.bf16.msrb.mxu3 %v3587_v54  ;;  %v4193_v54 = vld [vmem:[#allocation7 + $0x8] sm:$0xff]  ;;  %v1830_v55 = vpop.f32.mrf.mxu0 }
 0x10b   :  { %2068 = vmatpush.bf16.msrb.mxu1 %v3331_v34  ;;  %v3507_v34 = vor.u32 %v4137_v46, %v3504_v47  ;;  %v1843_v56 = vpop.f32.mrf.mxu1 }
 0x10c   :  { %2082 = vmatpush.bf16.msrb.mxu2 %v3443_v59  ;;  %2404 = vmatpush.bf16.msrb.mxu0 %v4197_v60  ;;  %v4207_v59 = vld [vmem:[#allocation7 + $0x78] sm:$0xff]  ;;  %v428_v60 = vperm.slane %v4605_v2, 1  ;;  %v1817_v63 = vpop.f32.mrf.mxu3 }
 0x10e   :  { %2095 = vmatpush.bf16.msrb.mxu3 %v3571_v62  ;;  %v4192_v62 = vld [vmem:[#allocation7] sm:$0xff] }
 0x10f   :  { %2069 = vmatpush.bf16.msrb.mxu1 %v3315_v15  ;;  %v3715_v15 = vor.u32 %v4189_v14, %v3712_v58  ;;  %v4211_v58 = vld [vmem:[#allocation7 + $0x98] sm:$0xff] }
 0x110   :  { %2083 = vmatpush.bf16.msrb.mxu2 %v3427_v21  ;;  %2405 = vmatpush.bf16.msrb.mxu0 %v4196_v7  ;;  %v1856_v0 = vpop.f32.mrf.mxu2  ;;  %v1816_v21 = vadd.f32 %v1815_v44, %v428_v60  ;;  %v2138_v7 = vpack.c.bf16 %v2134_v61, %v2134_v61  ;;  %v4214_v44 = vld [vmem:[#allocation7 + $0xb0] sm:$0xff] }
 0x111   :  { %v4210_v61 = vld [vmem:[#allocation7 + $0x90] sm:$0xff] }
 0x112   :  { %2096 = vmatpush.bf16.msrb.mxu3 %v3555_v8  ;;  %v4181_v8 = vld [vmem:[#allocation4 + $0x76c] sm:$0xf] }
 0x113   :  { %2070 = vmatpush.bf16.msrb.mxu1 %v3299_v11  ;;  %v3683_v11 = vor.u32 %v4181_v8, %v3680_v9 }
 0x114   :  { %2084 = vmatpush.bf16.msrb.mxu2 %v3411_v19  ;;  %2406 = vmatpush.bf16.msrb.mxu0 %v4195_v20  ;;  %v3648_v19 = vld [vmem:[#allocation4 + $0x738] sm:$0xf0]  ;;  %v4203_v20 = vld [vmem:[#allocation7 + $0x58] sm:$0xff] }
 0x116   :  { %2097 = vmatpush.bf16.msrb.mxu3 %v3539_v3 }
 0x117   :  { %2071 = vmatpush.bf16.msrb.mxu1 %v3283_v28 }
 0x118   :  { %2085 = vmatpush.bf16.msrb.mxu2 %v3395_v37  ;;  %2407 = vmatpush.bf16.msrb.mxu0 %v4194_v38  ;;  %v4201_v37 = vld [vmem:[#allocation7 + $0x48] sm:$0xff] }
 0x11a   :  { %2098 = vmatpush.bf16.msrb.mxu3 %v3523_v26  ;;  %v4215_v26 = vld [vmem:[#allocation7 + $0xb8] sm:$0xff] }
 0x11b   :  { %2072 = vmatpush.bf16.msrb.mxu1 %v3267_v45  ;;  %v4200_v45 = vld [vmem:[#allocation7 + $0x40] sm:$0xff] }
 0x11c   :  { %2086 = vmatpush.bf16.msrb.mxu2 %v3379_v6  ;;  %2408 = vmatpush.bf16.msrb.mxu0 %v4193_v54 }
 0x11e   :  { %2099 = vmatpush.bf16.msrb.mxu3 %v3507_v34 }
 0x11f   :  { %2073 = vmatpush.bf16.msrb.mxu1 %v3251_v22  ;;  %2087 = vmatmul.bf16.vlgmr.msrb.gmra.mxu2 %v4579_v48  ;;  %v1829_v48 = vadd.f32 %v4629_v23, %v1816_v21 }
 0x120   :  { %2409 = vmatpush.bf16.msrb.mxu0 %v4192_v62  ;;  %v1880_v24 = vpop.f32.mrf.mxu0  ;;  %2428 = vmatpush.bf16.msra.mxu2 %v4215_v26  ;;  %v429_v62 = vperm.slane %v4605_v2, 2  ;;  %v430_v26 = vperm.slane %v4605_v2, 3 }
 0x121   :  { %2100 = vmatmul.bf16.vlgmr.msrb.gmra.mxu3 %v4573_v36  ;;  %v1842_v36 = vadd.f32 %v4631_v31, %v1829_v48  ;;  %v3635_v31 = vor.u32 %v4169_v29, %v3632_v30 }
 0x122   :  { %2106 = vmatpush.bf16.msra.mxu3 %v1700_v57  ;;  %2074 = vmatmul.bf16.vlgmr.msrb.gmra.mxu1 %v4575_v40  ;;  %v4173_v40 = vld [vmem:[#allocation4 + $0x72c] sm:$0xf]  ;;  %v1906_v27 = vpop.f32.mrf.mxu2  ;;  %v4212_v57 = vld [vmem:[#allocation7 + $0xa0] sm:$0xff] }
 0x123   :  { %2415 = vmatpush.bf16.msra.mxu1 %v4207_v59  ;;  %2410 = vmatmul.bf16.vlgmr.msrb.gmra.mxu0 %v2138_v7  ;;  %v1855_v3 = vadd.f32 %v1854_v49, %v1842_v36  ;;  %v3651_v25 = vor.u32 %v4173_v40, %v3648_v19  ;;  %v1893_v28 = vpop.f32.mrf.mxu1 }
 0x124   :  { %v1867_v23 = vpop.f32.mrf.mxu3  ;;  %2429 = vmatpush.bf16.msra.mxu2 %v4214_v44 }
 0x125   :  { %v1868_v33 = vadd.f32 %v1867_v23, %v1855_v3 }
 0x126   :  { %2107 = vmatpush.bf16.msra.mxu3 %v3715_v15  ;;  %v4209_v15 = vld [vmem:[#allocation7 + $0x88] sm:$0xff] }
 0x127   :  { %2416 = vmatpush.bf16.msra.mxu1 %v4206_v5  ;;  %v1881_v35 = vadd.f32 %v1880_v24, %v1868_v33 }
 0x128   :  { %v1882_v39 = vpop.f32.mrf.mxu0  ;;  %2430 = vmatpush.bf16.msra.mxu2 %v4213_v16  ;;  %v4216_v16 = vld [vmem:[#allocation7 + $0xc0] sm:$0xff] }
 0x129   :  { %v1894_v38 = vadd.f32 %v1893_v28, %v1881_v35  ;;  %v4222_v35 = vld [vmem:[#allocation7 + $0xf0] sm:$0xff] }
 0x12a   :  { %2108 = vmatpush.bf16.msra.mxu3 %v3699_v51  ;;  %v1908_v43 = vpop.f32.mrf.mxu2 }
 0x12b   :  { %2417 = vmatpush.bf16.msra.mxu1 %v4205_v10  ;;  %v1907_v42 = vadd.f32 %v1906_v27, %v1894_v38  ;;  %v1895_v47 = vpop.f32.mrf.mxu1  ;;  %v4220_v38 = vld [vmem:[#allocation7 + $0xe0] sm:$0xff] }
 0x12c   :  { %v1869_v46 = vpop.f32.mrf.mxu3  ;;  %2431 = vmatpush.bf16.msra.mxu2 %v4212_v57  ;;  %v4218_v47 = vld [vmem:[#allocation7 + $0xd0] sm:$0xff] }
 0x12d   :  { %v2119_v49 = vmul.f32 0.5, %v1907_v42 }
 0x12e   :  { %2109 = vmatpush.bf16.msra.mxu3 %v3683_v11 }
 0x12f   :  { %2418 = vmatpush.bf16.msra.mxu1 %v4204_v17  ;;  %4265 = vtanh.f32 %v2119_v49 }
 0x130   :  { %2432 = vmatpush.bf16.msra.mxu2 %v4211_v58 }
 0x132   :  { %2110 = vmatpush.bf16.msra.mxu3 %v3667_v18 }
 0x133   :  { %2419 = vmatpush.bf16.msra.mxu1 %v4203_v20 }
 0x134   :  { %2433 = vmatpush.bf16.msra.mxu2 %v4210_v61 }
 0x135   :  { %v4266_v50 = vpop.eup %4265 }
 0x136   :  { %2111 = vmatpush.bf16.msra.mxu3 %v3651_v25  ;;  %v2127_v52 = vadd.f32 1.0, %v4266_v50 }
 0x137   :  { %2420 = vmatpush.bf16.msra.mxu1 %v4202_v32  ;;  %v4223_v32 = vld [vmem:[#allocation7 + $0xf8] sm:$0xff] }
 0x138   :  { %v2131_v53 = vmul.f32 0.5, %v2127_v52  ;;  %2434 = vmatpush.bf16.msra.mxu2 %v4209_v15  ;;  %v4217_v52 = vld [vmem:[#allocation7 + $0xc8] sm:$0xff] }
 0x13a   :  { %2112 = vmatpush.bf16.msra.mxu3 %v3635_v31  ;;  %v2135_v6 = vmul.f32 %v2131_v53, %v1907_v42  ;;  %v4219_v42 = vld [vmem:[#allocation7 + $0xd8] sm:$0xff] }
 0x13b   :  { %2421 = vmatpush.bf16.msra.mxu1 %v4201_v37  ;;  %v4221_v37 = vld [vmem:[#allocation7 + $0xe8] sm:$0xff] }
 0x13c   :  { %v2139_v54 = vpack.c.bf16 %v2135_v6, %v2135_v6  ;;  %2435 = vmatpush.bf16.msra.mxu2 %v4208_v1 }
 0x13d   :  { %3719 = vmatmul.msk.bf16.vlgmr.msra.gmra.mxu3 %vm1685_vm1, %v4577_v41 }
 0x13e   :  { %2441 = vmatpush.bf16.msrb.mxu3 %v4223_v32  ;;  %v4235_v32 = vld [vmem:[#allocation10 + $0x18] sm:$0xff] }
 0x13f   :  { %2422 = vmatpush.bf16.msra.mxu1 %v4200_v45 }
 0x140   :  { %v1945_v55 = vpop.f32.mrf.mxu0 }
 0x142   :  { %2423 = vmatmul.bf16.vlgmr.msra.gmra.mxu1 %v2139_v54  ;;  %v1919_v34 = vpop.f32.mrf.mxu2  ;;  %2442 = vmatpush.bf16.msrb.mxu3 %v4222_v35  ;;  %v4233_v35 = vld [vmem:[#allocation10 + $0x8] sm:$0xff] }
 0x143   :  { %v1958_v56 = vpop.f32.mrf.mxu1  ;;  %v1920_v63 = vadd.f32 %v1919_v34, %v429_v62 }
 0x144   :  { %v1932_v22 = vpop.f32.mrf.mxu3 }
 0x145   :  { %v1933_v0 = vadd.f32 %v1932_v22, %v1920_v63 }
 0x146   :  { %2443 = vmatpush.bf16.msrb.mxu3 %v4221_v37  ;;  %v4247_v37 = vld [vmem:[#allocation12 + $0x38] sm:$0xff] }
 0x147   :  { %v1946_v4 = vadd.f32 %v1945_v55, %v1933_v0  ;;  %2702 = vmatpush.bf16.msrb.mxu2 %v4247_v37 }
 0x148   :  { %v1947_v14 = vpop.f32.mrf.mxu0 }
 0x149   :  { %v1959_v5 = vadd.f32 %v1958_v56, %v1946_v4 }
 0x14a   :  { %v1921_v41 = vpop.f32.mrf.mxu2  ;;  %2444 = vmatpush.bf16.msrb.mxu3 %v4220_v38  ;;  %v4246_v38 = vld [vmem:[#allocation12 + $0x30] sm:$0xff] }
 0x14b   :  { %v1960_v60 = vpop.f32.mrf.mxu1  ;;  %v4259_v41 = vld [vmem:[%s4665_s4] ss:$0 sm:$0xff]  ;;  %2703 = vmatpush.bf16.msrb.mxu2 %v4246_v38 }
 0x14c   :  { %v1934_v59 = vpop.f32.mrf.mxu3 }
 0x14e   :  { %2445 = vmatpush.bf16.msrb.mxu3 %v4219_v42 }
 0x152   :  { %2446 = vmatpush.bf16.msrb.mxu3 %v4218_v47 }
 0x156   :  { %2447 = vmatpush.bf16.msrb.mxu3 %v4217_v52 }
 0x15a   :  { %2448 = vmatpush.bf16.msrb.mxu3 %v4216_v16  ;;  %v4240_v16 = vld [vmem:[#allocation12] sm:$0xff] }
 0x15f   :  { %v2010_v21 = vpop.f32.mrf.mxu1 }
 0x160   :  { %v1997_v7 = vpop.f32.mrf.mxu0 }
 0x162   :  { %v1971_v51 = vpop.f32.mrf.mxu2 }
 0x163   :  { %v1972_v8 = vadd.f32 %v1971_v51, %v1959_v5  ;;  %v4229_v51 = vld [vmem:[#allocation9 + $0x28] sm:$0xff] }
 0x164   :  { %v1984_v9 = vpop.f32.mrf.mxu3 }
 0x165   :  { %v1985_v10 = vadd.f32 %v1984_v9, %v1972_v8 }
 0x167   :  { %v1998_v48 = vadd.f32 %v1997_v7, %v1985_v10  ;;  %v2012_v11 = vpop.f32.mrf.mxu1  ;;  %v4230_v7 = vld [vmem:[#allocation9 + $0x30] sm:$0xff] }
 0x168   :  { %v1999_v12 = vpop.f32.mrf.mxu0  ;;  %v4227_v11 = vld [vmem:[#allocation9 + $0x18] sm:$0xff] }
 0x169   :  { %v2011_v13 = vadd.f32 %v2010_v21, %v1998_v48  ;;  %v4231_v21 = vld [vmem:[#allocation9 + $0x38] sm:$0xff]  ;;  %v4228_v48 = vld [vmem:[#allocation9 + $0x20] sm:$0xff]  ;;  %v4226_v12 = vld [vmem:[#allocation9 + $0x10] sm:$0xff] }
 0x16a   :  { %v1973_v17 = vpop.f32.mrf.mxu2  ;;  %2528 = vmatpush.bf16.msra.mxu0 %v4231_v21 }
 0x16b   :  { %v2120_v36 = vmul.f32 0.5, %v2011_v13  ;;  %v4224_v17 = vld [vmem:[#allocation9] sm:$0xff] }
 0x16c   :  { %v1986_v18 = vpop.f32.mrf.mxu3 }
 0x16d   :  { %4267 = vtanh.f32 %v2120_v36  ;;  %v4239_v36 = vld [vmem:[#allocation10 + $0x38] sm:$0xff]  ;;  %v4238_v18 = vld [vmem:[#allocation10 + $0x30] sm:$0xff] }
 0x16e   :  { %2529 = vmatpush.bf16.msra.mxu0 %v4230_v7  ;;  %2615 = vmatpush.bf16.msrb.mxu1 %v4239_v36 }
 0x172   :  { %2530 = vmatpush.bf16.msra.mxu0 %v4229_v51  ;;  %2616 = vmatpush.bf16.msrb.mxu1 %v4238_v18 }
 0x173   :  { %v4268_v40 = vpop.eup %4267 }
 0x174   :  { %v2128_v19 = vadd.f32 1.0, %v4268_v40  ;;  %v4237_v40 = vld [vmem:[#allocation10 + $0x28] sm:$0xff] }
 0x176   :  { %v2132_v20 = vmul.f32 0.5, %v2128_v19  ;;  %2531 = vmatpush.bf16.msra.mxu0 %v4228_v48  ;;  %2617 = vmatpush.bf16.msrb.mxu1 %v4237_v40 }
 0x178   :  { %v2136_v3 = vmul.f32 %v2132_v20, %v2011_v13  ;;  %v4225_v13 = vld [vmem:[#allocation9 + $0x8] sm:$0xff] }
 0x17a   :  { %v2140_v24 = vpack.c.bf16 %v2136_v3, %v2136_v3  ;;  %2532 = vmatpush.bf16.msra.mxu0 %v4227_v11 }
 0x17c   :  { %2436 = vmatmul.bf16.vlgmr.msra.gmra.mxu2 %v2140_v24 }
 0x17e   :  { %2533 = vmatpush.bf16.msra.mxu0 %v4226_v12 }
 0x17f   :  { %v2023_v25 = vpop.f32.mrf.mxu1 }
 0x180   :  { %v2062_v27 = vpop.f32.mrf.mxu0  ;;  %v2024_v45 = vadd.f32 %v2023_v25, %v430_v26  ;;  %v4260_v26 = vld [vmem:[%s4667_s6] ss:$0 sm:$0xff] }
 0x182   :  { %v2036_v23 = vpop.f32.mrf.mxu2  ;;  %2534 = vmatpush.bf16.msra.mxu0 %v4225_v13 }
 0x183   :  { %v2037_v50 = vadd.f32 %v2036_v23, %v2024_v45 }
 0x184   :  { %v2049_v28 = vpop.f32.mrf.mxu3 }
 0x185   :  { %v2050_v54 = vadd.f32 %v2049_v28, %v2037_v50 }
 0x186   :  { %2535 = vmatpush.bf16.msra.mxu0 %v4224_v17 }
 0x187   :  { %v2025_v29 = vpop.f32.mrf.mxu1  ;;  %v2063_v34 = vadd.f32 %v2062_v27, %v2050_v54  ;;  %v4242_v54 = vld [vmem:[#allocation12 + $0x10] sm:$0xff] }
 0x188   :  { %v2064_v30 = vpop.f32.mrf.mxu0 }
 0x189   :  { %v4236_v30 = vld [vmem:[#allocation10 + $0x20] sm:$0xff] }
 0x18a   :  { %v2038_v33 = vpop.f32.mrf.mxu2  ;;  %2618 = vmatpush.bf16.msrb.mxu1 %v4236_v30 }
 0x18b   :  { %v4234_v33 = vld [vmem:[#allocation10 + $0x10] sm:$0xff] }
 0x18c   :  { %v2051_v31 = vpop.f32.mrf.mxu3 }
 0x18d   :  { %v4232_v31 = vld [vmem:[#allocation10] sm:$0xff] }
 0x18e   :  { %2619 = vmatpush.bf16.msrb.mxu1 %v4235_v32 }
 0x192   :  { %2620 = vmatpush.bf16.msrb.mxu1 %v4234_v33 }
 0x196   :  { %2621 = vmatpush.bf16.msrb.mxu1 %v4233_v35 }
 0x19a   :  { %2622 = vmatpush.bf16.msrb.mxu1 %v4232_v31 }
 0x19f   :  { %v2075_v39 = vpop.f32.mrf.mxu1 }
 0x1a0   :  { %v2411_v43 = vpop.f32.mrf.mxu0  ;;  %v2076_v2 = vadd.f32 %v2075_v39, %v2063_v34  ;;  %v4245_v39 = vld [vmem:[#allocation12 + $0x28] sm:$0xff]  ;;  %v4261_v34 = vld [vmem:[%s4669_s8] ss:$0 sm:$0xff] }
 0x1a1   :  { %v2412_v60 = vadd.f32 %v4259_v41, %v2411_v43  ;;  %2704 = vmatpush.bf16.msrb.mxu2 %v4245_v39 }
 0x1a2   :  { %v2088_v44 = vpop.f32.mrf.mxu2 }
 0x1a3   :  { %v2089_v22 = vadd.f32 %v2088_v44, %v2076_v2 }
 0x1a4   :  { %v2101_v46 = vpop.f32.mrf.mxu3 }
 0x1a5   :  { %v2102_v56 = vadd.f32 %v2101_v46, %v2089_v22 }
 0x1a7   :  { %v2077_v49 = vpop.f32.mrf.mxu1 }
 0x1a8   :  { %v2413_v53 = vpop.f32.mrf.mxu0 }
 0x1a9   :  { %v4244_v53 = vld [vmem:[#allocation12 + $0x20] sm:$0xff] }
 0x1aa   :  { %v2090_v6 = vpop.f32.mrf.mxu2  ;;  %2705 = vmatpush.bf16.msrb.mxu2 %v4244_v53 }
 0x1ab   :  { %v4243_v6 = vld [vmem:[#allocation12 + $0x18] sm:$0xff] }
 0x1ac   :  { %v2103_v55 = vpop.f32.mrf.mxu3 }
 0x1ad   :  { %v4241_v55 = vld [vmem:[#allocation12 + $0x8] sm:$0xff] }
 0x1ae   :  { %2706 = vmatpush.bf16.msrb.mxu2 %v4243_v6 }
 0x1b2   :  { %2707 = vmatpush.bf16.msrb.mxu2 %v4242_v54 }
 0x1b6   :  { %2708 = vmatpush.bf16.msrb.mxu2 %v4241_v55 }
 0x1ba   :  { %2709 = vmatpush.bf16.msrb.mxu2 %v4240_v16 }
 0x1bf   :  { %v2424_v62 = vpop.f32.mrf.mxu1 }
 0x1c0   :  { %v2114_v57 = vpop.f32.mrf.mxu3  ;;  %v2425_v63 = vadd.f32 %v2424_v62, %v2412_v60  ;;  %v4262_v62 = vld [vmem:[%s4671_s10] ss:$0 sm:$0xff] }
 0x1c1   :  { %v2115_v14 = vadd.f32 %v2114_v57, %v2102_v56 }
 0x1c3   :  { %v2121_v58 = vmul.f32 0.5, %v2115_v14 }
 0x1c5   :  { %4269 = vtanh.f32 %v2121_v58 }
 0x1c7   :  { %v2426_v5 = vpop.f32.mrf.mxu1 }
 0x1c8   :  { %v2116_v59 = vpop.f32.mrf.mxu3 }
 0x1cb   :  { %v4270_v61 = vpop.eup %4269 }
 0x1cc   :  { %v2129_v15 = vadd.f32 1.0, %v4270_v61 }
 0x1ce   :  { %v2133_v0 = vmul.f32 0.5, %v2129_v15 }
 0x1d0   :  { %v2137_v1 = vmul.f32 %v2133_v0, %v2115_v14 }
 0x1d2   :  { %v2141_v4 = vpack.c.bf16 %v2137_v1, %v2137_v1 }
 0x1d4   :  { %2449 = vmatmul.bf16.vlgmr.msrb.gmra.mxu3 %v2141_v4 }
 0x1ff   :  { %v2437_v8 = vpop.f32.mrf.mxu2 }
 0x200   :  { %v2438_v9 = vadd.f32 %v2437_v8, %v2425_v63 }
 0x207   :  { %v2439_v10 = vpop.f32.mrf.mxu2 }
 0x257   :  { %v2450_v19 = vpop.f32.mrf.mxu3 }
 0x258   :  { %v2451_v20 = vadd.f32 %v2450_v19, %v2438_v9 }
 0x25a   :  { %v2454_v3 = vmul.f32 0.5, %v2451_v20 }
 0x25c   :  { %4271 = vtanh.f32 %v2454_v3 }
 0x25f   :  { %v2452_v24 = vpop.f32.mrf.mxu3 }
 0x262   :  { %v4272_v25 = vpop.eup %4271 }
 0x263   :  { %v2456_v27 = vadd.f32 1.0, %v4272_v25 }
 0x265   :  { %v2457_v23 = vmul.f32 0.5, %v2456_v27 }
 0x267   :  { %v2458_v28 = vmul.f32 %v2457_v23, %v2451_v20 }
 0x269   :  { %v2459_v29 = vpack.c.bf16 %v2458_v28, %v2458_v28 }
 0x26b   :  { %2536 = vmatmul.bf16.vlgmr.msra.gmra.mxu0 %v2459_v29 }
 0x2e8   :  { %v2537_v42 = vpop.f32.mrf.mxu0 }
 0x2e9   :  { %v2538_v43 = vadd.f32 %v4260_v26, %v2537_v42 }
 0x2eb   :  { %v2541_v44 = vmul.f32 0.5, %v2538_v43 }
 0x2ed   :  { %4273 = vtanh.f32 %v2541_v44 }
 0x2f0   :  { %v2539_v45 = vpop.f32.mrf.mxu0 }
 0x2f3   :  { %v4274_v46 = vpop.eup %4273 }
 0x2f4   :  { %v2543_v47 = vadd.f32 1.0, %v4274_v46 }
 0x2f6   :  { %v2544_v49 = vmul.f32 0.5, %v2543_v47 }
 0x2f8   :  { %v2545_v50 = vmul.f32 %v2544_v49, %v2538_v43 }
 0x2fa   :  { %v2546_v52 = vpack.c.bf16 %v2545_v50, %v2545_v50 }
 0x2fc   :  { %2623 = vmatmul.bf16.vlgmr.msrb.gmra.mxu1 %v2546_v52 }
 0x379   :  { %v2624_v2 = vpop.f32.mrf.mxu1 }
 0x37a   :  { %v2625_v22 = vadd.f32 %v4261_v34, %v2624_v2 }
 0x37c   :  { %v2628_v56 = vmul.f32 0.5, %v2625_v22 }
 0x37e   :  { %4275 = vtanh.f32 %v2628_v56 }
 0x381   :  { %v2626_v57 = vpop.f32.mrf.mxu1 }
 0x384   :  { %v4276_v14 = vpop.eup %4275 }
 0x385   :  { %v2630_v58 = vadd.f32 1.0, %v4276_v14 }
 0x387   :  { %v2631_v41 = vmul.f32 0.5, %v2630_v58 }
 0x389   :  { %v2632_v59 = vmul.f32 %v2631_v41, %v2625_v22 }
 0x38b   :  { %v2633_v60 = vpack.c.bf16 %v2632_v59, %v2632_v59 }
 0x38d   :  { %2710 = vmatmul.bf16.vlgmr.msrb.gmra.mxu2 %v2633_v60 }
 0x410   :  { %v2711_v61 = vpop.f32.mrf.mxu2 }
 0x411   :  { %v2712_v63 = vadd.f32 %v4262_v62, %v2711_v61 }
 0x413   :  { %2715 = vst [vmem:[%s4672_s11] sm:$0x3] %v2712_v63 }
 0x418   :  { %v2713_v15 = vpop.f32.mrf.mxu2 }
 0x419   :  { %2720 = vsyncpa [#allocation3], 1 }
 0x41a   :  { %2721 = vsyncpa [#allocation5], 1 }
 0x41b   :  { %2722 = vsyncpa [#allocation8], 1 }
 0x41c   :  { %2723 = vsyncpa [#allocation11], 1 }

</bundles_post_ra>
